<compile_context>
chip_gen: v7x
topology: tpu7x:2x2x1
jax: 0.10.0
libtpu: 0.0.40
codegen_flags: <defaults>
</compile_context>

<pallas_src>
import functools
import math

import jax
import jax.numpy as jnp
from jax.experimental import pallas as pl
from jax.experimental.pallas import tpu as pltpu


# ---------------------------------------------------------------------------
# helpers
# ---------------------------------------------------------------------------
def _round_up(n, m):
    return ((n + m - 1) // m) * m


def _silu(x):
    return x * jax.nn.sigmoid(x)


def get_timestep_embedding(timesteps, embedding_dim, max_positions=10000):
    half_dim = embedding_dim // 2
    emb = math.log(max_positions) / (half_dim - 1)
    emb = jnp.exp(jnp.arange(half_dim, dtype=jnp.float32) * -emb)
    emb = timesteps.astype(jnp.float32)[:, None] * emb[None, :]
    emb = jnp.concatenate([jnp.sin(emb), jnp.cos(emb)], axis=1)
    if embedding_dim % 2 == 1:
        emb = jnp.pad(emb, ((0, 0), (0, 1)))
    return emb


# ---------------------------------------------------------------------------
# Fused Pallas kernel: whole U-Net forward in VMEM
# ---------------------------------------------------------------------------
def _sgm_fused_kernel(temb_ref, x_ref, w_ref, b_ref, o_ref, skip_ref, *, plan):
    """temb_ref: (bt, P) f32 sinusoidal embedding (zero-padded, lane-dense)
       x_ref   : (bt, P) f32 input features (zero-padded)
       w_ref   : (NW, P, P) bf16 stacked zero-padded weight matrices
       b_ref   : (NB, P) f32 stacked zero-padded bias rows
       o_ref   : (bt, P) output (valid lanes [0, emb_size))
       skip_ref: (n_skips, bt, P) f32 VMEM scratch for encoder skips."""

    def W(i):                                   # (P, P) bf16, static index
        return w_ref[i]

    def Bv(i):                                  # (1, P) f32, static slice
        return b_ref[pl.ds(i, 1), :]

    def mm(v, wi):
        # bf16 x bf16 MXU dot, f32 accumulate.
        return jnp.dot(v.astype(jnp.bfloat16), W(wi),
                       preferred_element_type=jnp.float32)

    def lin(v, wi, bi):
        return mm(v, wi) + Bv(bi)

    # --- timestep-embedding MLP: Linear -> SiLU -> Linear -------------------
    temb = _silu(lin(temb_ref[...], *plan["temb0"]))
    temb = lin(temb, *plan["temb1"])

    # --- input projection ----------------------------------------------------
    h = lin(x_ref[...], *plan["inputs"])

    # --- encoder blocks (skips parked in VMEM scratch) -----------------------
    for i, (iw1, ib1, iwt, ibt, iw2, ib2) in enumerate(plan["enc"]):
        t = _silu(lin(h, iw1, ib1))
        t = t + lin(temb, iwt, ibt)
        h = _silu(lin(t, iw2, ib2))
        skip_ref[i] = h

    # --- bottom block --------------------------------------------------------
    h = lin(h, *plan["bottom"])

    # --- decoder blocks: fused K=2P dot replaces concat([skip, h]) ----------
    n_enc = len(plan["enc"])
    for j, (iw1s, iw1h, ib1, iwt, ibt, iw2, ib2) in enumerate(plan["dec"]):
        skip = skip_ref[n_enc - 1 - j]
        # lane-concat [skip, h] (adjacent vregs) against sublane-stacked
        # [W1_skip; W1_h] -> one K=2P MXU push chain (fills 256-deep MXU).
        lhs = jnp.concatenate([skip, h], axis=-1).astype(jnp.bfloat16)
        w1 = jnp.concatenate([W(iw1s), W(iw1h)], axis=0)
        t = jnp.dot(lhs, w1, preferred_element_type=jnp.float32) + Bv(ib1)
        t = _silu(t)
        t = t + lin(temb, iwt, ibt)
        h = _silu(lin(t, iw2, ib2))

    # --- output projection ----------------------------------------------------
    o_ref[...] = lin(h, *plan["outputs"]).astype(o_ref.dtype)


# ---------------------------------------------------------------------------
# Parameter init (canonical, unpadded) + packing into lane-dense stacks
# ---------------------------------------------------------------------------
def _vs_uniform(key, din, dout):
    # variance_scaling(scale=1.0, mode='fan_avg', distribution='uniform')
    limit = math.sqrt(3.0 / ((din + dout) / 2.0))
    return jax.random.uniform(key, (din, dout), jnp.float32, -limit, limit)


def _linear_params(key, din, dout, zero_bias=True):
    kw, kb = jax.random.split(key)
    w = _vs_uniform(kw, din, dout)               # stored as (in, out) == W.T
    if zero_bias:
        b = jnp.zeros((dout,), jnp.float32)
    else:
        bound = 1.0 / math.sqrt(din)
        b = jax.random.uniform(kb, (dout,), jnp.float32, -bound, bound)
    return (w, b)


def init_sgm_params(key, emb_size, encoder_dim):
    tdim = emb_size * 4
    keys = iter(jax.random.split(key, 64))
    params = {}
    params["temb0"] = _linear_params(next(keys), emb_size, tdim, zero_bias=True)
    params["temb1"] = _linear_params(next(keys), tdim, tdim, zero_bias=True)
    params["inputs"] = _linear_params(next(keys), emb_size, encoder_dim[0],
                                      zero_bias=False)
    enc = []
    for i in range(len(encoder_dim) - 1):
        d_in, d_out = encoder_dim[i], encoder_dim[i + 1]
        w1, b1 = _linear_params(next(keys), d_in, d_out, zero_bias=False)
        wt, bt = _linear_params(next(keys), tdim, d_out, zero_bias=False)
        w2, b2 = _linear_params(next(keys), d_out, d_out, zero_bias=False)
        enc.append((w1, b1, wt, bt, w2, b2))
    params["encoder"] = enc
    params["bottom"] = _linear_params(next(keys), encoder_dim[-1],
                                      encoder_dim[-1], zero_bias=False)
    dec_dims = list(reversed(encoder_dim))
    dec = []
    for i in range(len(dec_dims) - 1):
        d_in, d_out = dec_dims[i], dec_dims[i + 1]
        w1, b1 = _linear_params(next(keys), d_in * 2, d_in, zero_bias=False)
        wt, bt = _linear_params(next(keys), tdim, d_in, zero_bias=False)
        w2, b2 = _linear_params(next(keys), d_in, d_out, zero_bias=False)
        dec.append((w1, b1, wt, bt, w2, b2))
    params["decoder"] = dec
    params["outputs"] = _linear_params(next(keys), encoder_dim[0], emb_size,
                                       zero_bias=False)
    return params


def pack_params(params, emb_size, encoder_dim, lane=128):
    """Zero-pad every weight/bias to lane-dense (P, P) / (P,) and stack.
    Weights are stored bf16 (halves the dominant weight DMA, bf16 MXU path);
    biases stay f32 so the epilogue is f32.  Padded rows/cols are zero so
    padded lanes stay exactly zero end-to-end."""
    tdim = emb_size * 4
    P = _round_up(max([emb_size, tdim] + list(encoder_dim)), lane)

    Ws, Bs = [], []

    def pad_w(w):
        Ws.append(jnp.zeros((P, P), jnp.float32)
                  .at[: w.shape[0], : w.shape[1]].set(w))
        return len(Ws) - 1

    def pad_b(b):
        Bs.append(jnp.zeros((P,), jnp.float32).at[: b.shape[0]].set(b))
        return len(Bs) - 1

    plan = {}
    for name in ("temb0", "temb1", "inputs"):
        w, b = params[name]
        plan[name] = (pad_w(w), pad_b(b))

    plan["enc"] = []
    for (w1, b1, wt, bt, w2, b2) in params["encoder"]:
        plan["enc"].append((pad_w(w1), pad_b(b1), pad_w(wt), pad_b(bt),
                            pad_w(w2), pad_b(b2)))

    w, b = params["bottom"]
    plan["bottom"] = (pad_w(w), pad_b(b))

    plan["dec"] = []
    for (w1, b1, wt, bt, w2, b2) in params["decoder"]:
        d_in = w1.shape[0] // 2
        # split W1 into skip-half / h-half -> removes the concat entirely;
        # the kernel re-stacks them along K for one fused K=2P dot.
        plan["dec"].append((pad_w(w1[:d_in]), pad_w(w1[d_in:]), pad_b(b1),
                            pad_w(wt), pad_b(bt), pad_w(w2), pad_b(b2)))

    w, b = params["outputs"]
    plan["outputs"] = (pad_w(w), pad_b(b))

    W_stack = jnp.stack(Ws).astype(jnp.bfloat16)   # (NW, P, P) bf16
    B_stack = jnp.stack(Bs)                        # (NB, P)    f32
    return W_stack, B_stack, plan, P


# ---------------------------------------------------------------------------
# Forward driver (one pallas_call for the whole network)
# ---------------------------------------------------------------------------
def _choose_tile(B):
    """f32 activations: cap tile at 128 rows (vreg pressure); ensure >= 2
    grid steps whenever B >= 16 so v7x's two TensorCores both get work."""
    if B <= 8:
        return 8
    half = -(-B // 2)
    return min(128, _round_up(half, 8))


def sgm_forward(W_stack, B_stack, x, time_cond, *, plan, P, emb_size):
    B, d_in = x.shape
    bt = _choose_tile(B)
    Bp = _round_up(B, bt)
    grid = (Bp // bt,)
    NW = W_stack.shape[0]
    NB = B_stack.shape[0]
    n_skips = max(1, len(plan["enc"]))

    # Sinusoidal embedding: tiny XLA fusion jitted together with the call.
    temb_raw = get_timestep_embedding(time_cond, emb_size)            # (B, emb)
    temb_pad = jnp.zeros((Bp, P), jnp.float32).at[:B, :emb_size].set(temb_raw)
    x_pad = jnp.zeros((Bp, P), jnp.float32).at[:B, :d_in].set(
        x.astype(jnp.float32))

    out = pl.pallas_call(
        functools.partial(_sgm_fused_kernel, plan=plan),
        out_shape=jax.ShapeDtypeStruct((Bp, P), x.dtype),
        grid=grid,
        in_specs=[
            pl.BlockSpec((bt, P), lambda i: (i, 0)),          # temb (padded)
            pl.BlockSpec((bt, P), lambda i: (i, 0)),          # x    (padded)
            pl.BlockSpec((NW, P, P), lambda i: (0, 0, 0)),    # bf16 weights
            pl.BlockSpec((NB, P), lambda i: (0, 0)),          # f32 biases
        ],
        out_specs=pl.BlockSpec((bt, P), lambda i: (i, 0)),
        scratch_shapes=[pltpu.VMEM((n_skips, bt, P), jnp.float32)],
        compiler_params=pltpu.CompilerParams(
            dimension_semantics=("parallel",),
            vmem_limit_bytes=32 * 1024 * 1024),
    )(temb_pad, x_pad, W_stack, B_stack)

    return out[:B, :emb_size]


# ---------------------------------------------------------------------------
# Pure-JAX references (unpadded params) for numerical verification
# ---------------------------------------------------------------------------
def _ref_linear(x, w, b, bf16):
    if bf16:
        y = jnp.dot(x.astype(jnp.bfloat16), w.astype(jnp.bfloat16),
                    preferred_element_type=jnp.float32)
    else:
        y = jnp.dot(x, w, preferred_element_type=jnp.float32)
    return y + b


def _ref_block(x, t, w1, b1, wt, bt, w2, b2, bf16):
    h = _silu(_ref_linear(x, w1, b1, bf16))
    h = h + _ref_linear(t, wt, bt, bf16)
    return _silu(_ref_linear(h, w2, b2, bf16))


def sgm_forward_ref(params, x, time_cond, emb_size, bf16=False):
    temb = get_timestep_embedding(time_cond, emb_size)
    temb = _silu(_ref_linear(temb, *params["temb0"], bf16))
    temb = _ref_linear(temb, *params["temb1"], bf16)
    h = _ref_linear(x, *params["inputs"], bf16)
    skips = []
    for blk in params["encoder"]:
        h = _ref_block(h, temb, *blk, bf16)
        skips.append(h)
    h = _ref_linear(h, *params["bottom"], bf16)
    for skip, blk in zip(reversed(skips), params["decoder"]):
        h = _ref_block(jnp.concatenate([skip, h], axis=1), temb, *blk, bf16)
    return _ref_linear(h, *params["outputs"], bf16)


# ---------------------------------------------------------------------------
if __name__ == "__main__":
    B = 8
    EMB_SIZE = 32                 # emb_size
    ENCODER_DIM = [64, 32, 16]    # score_dim

    key = jax.random.PRNGKey(0)
    kx, kt, kp = jax.random.split(key, 3)
    x = jax.random.normal(kx, (B, EMB_SIZE), jnp.float32)
    time_cond = jax.random.uniform(kt, (B,), jnp.float32, 0.0, 999.0)

    params = init_sgm_params(kp, EMB_SIZE, ENCODER_DIM)
    W_stack, B_stack, plan, P = pack_params(params, EMB_SIZE, ENCODER_DIM)

    fwd = jax.jit(functools.partial(sgm_forward, plan=plan, P=P,
                                    emb_size=EMB_SIZE))
    out = jax.block_until_ready(fwd(W_stack, B_stack, x, time_cond))

    # bf16-matched reference (same dot-input casts as the kernel): tight check.
    ref_bf16 = sgm_forward_ref(params, x, time_cond, EMB_SIZE, bf16=True)
    # full-f32 reference: loose sanity check on bf16 quantization drift.
    ref_f32 = sgm_forward_ref(params, x, time_cond, EMB_SIZE, bf16=False)

    assert out.shape == (B, EMB_SIZE), out.shape
    assert jnp.all(jnp.isfinite(out))
    assert jnp.allclose(out, ref_bf16, rtol=1e-3, atol=1e-3), float(
        jnp.max(jnp.abs(out - ref_bf16)))
    assert jnp.allclose(out, ref_f32, rtol=1e-1, atol=1e-1), float(
        jnp.max(jnp.abs(out - ref_f32)))

    print("KERNEL_OK")
</pallas_src>

<mosaic_0001>
module attributes {stable_mosaic.version = 11 : i64} {
  func.func @_sgm_fused_kernel(%arg0: i32, %arg1: memref<8x128xf32, #tpu.memory_space<vmem>>, %arg2: memref<8x128xf32, #tpu.memory_space<vmem>>, %arg3: memref<19x128x128xbf16, #tpu.memory_space<vmem>>, %arg4: memref<17x128xf32, #tpu.memory_space<vmem>>, %arg5: memref<8x128xf32, #tpu.memory_space<vmem>>, %arg6: memref<2x8x128xf32, #tpu.memory_space<vmem>>) attributes {dimension_semantics = [#tpu.dimension_semantics<parallel>], iteration_bounds = array<i64: 1>, scalar_prefetch = 0 : i64, scratch_operands = 1 : i64, tpu.core_type = #tpu.core_type<tc>, window_params = [{transform_indices = @transform_0, window_bounds = array<i64: 8, 128>}, {transform_indices = @transform_1, window_bounds = array<i64: 8, 128>}, {pipeline_mode = #tpu.pipeline_mode<synchronous>, transform_indices = @transform_2, window_bounds = array<i64: 19, 128, 128>}, {pipeline_mode = #tpu.pipeline_mode<synchronous>, transform_indices = @transform_3, window_bounds = array<i64: 17, 128>}, {transform_indices = @transform_4, window_bounds = array<i64: 8, 128>}]} {
    %c0 = arith.constant 0 : index
    %c0_0 = arith.constant 0 : index
    %0 = vector.load %arg1[%c0, %c0_0] : memref<8x128xf32, #tpu.memory_space<vmem>>, vector<8x128xf32>
    %1 = arith.truncf %0 : vector<8x128xf32> to vector<8x128xbf16>
    %c0_1 = arith.constant 0 : index
    %c0_2 = arith.constant 0 : index
    %c0_3 = arith.constant 0 : index
    %2 = vector.load %arg3[%c0_1, %c0_2, %c0_3] : memref<19x128x128xbf16, #tpu.memory_space<vmem>>, vector<1x128x128xbf16>
    %3 = vector.shape_cast %2 : vector<1x128x128xbf16> to vector<128x128xbf16>
    %cst = arith.constant dense<0.000000e+00> : vector<8x128xf32>
    %4 = tpu.matmul %1, %3, %cst {dimension_numbers = #tpu.dot_dimension_numbers<[1], [0], [0], [1], [0, 0, 1, 1], [], []>} : vector<8x128xbf16>, vector<128x128xbf16>, vector<8x128xf32> -> vector<8x128xf32>
    %c0_4 = arith.constant 0 : index
    %c0_5 = arith.constant 0 : index
    %5 = vector.load %arg4[%c0_4, %c0_5] : memref<17x128xf32, #tpu.memory_space<vmem>>, vector<1x128xf32>
    %6 = vector.broadcast %5 : vector<1x128xf32> to vector<8x128xf32>
    %7 = arith.addf %4, %6 : vector<8x128xf32>
    %8 = arith.negf %7 : vector<8x128xf32>
    %9 = math.exp %8 : vector<8x128xf32>
    %cst_6 = arith.constant 1.000000e+00 : f32
    %10 = vector.broadcast %cst_6 : f32 to vector<8x128xf32>
    %11 = arith.addf %10, %9 : vector<8x128xf32>
    %12 = arith.divf %10, %11 : vector<8x128xf32>
    %13 = arith.mulf %7, %12 : vector<8x128xf32>
    %14 = arith.truncf %13 : vector<8x128xf32> to vector<8x128xbf16>
    %c1 = arith.constant 1 : index
    %c0_7 = arith.constant 0 : index
    %c0_8 = arith.constant 0 : index
    %15 = vector.load %arg3[%c1, %c0_7, %c0_8] : memref<19x128x128xbf16, #tpu.memory_space<vmem>>, vector<1x128x128xbf16>
    %16 = vector.shape_cast %15 : vector<1x128x128xbf16> to vector<128x128xbf16>
    %cst_9 = arith.constant dense<0.000000e+00> : vector<8x128xf32>
    %17 = tpu.matmul %14, %16, %cst_9 {dimension_numbers = #tpu.dot_dimension_numbers<[1], [0], [0], [1], [0, 0, 1, 1], [], []>} : vector<8x128xbf16>, vector<128x128xbf16>, vector<8x128xf32> -> vector<8x128xf32>
    %c1_10 = arith.constant 1 : index
    %c0_11 = arith.constant 0 : index
    %18 = vector.load %arg4[%c1_10, %c0_11] : memref<17x128xf32, #tpu.memory_space<vmem>>, vector<1x128xf32>
    %19 = vector.broadcast %18 : vector<1x128xf32> to vector<8x128xf32>
    %20 = arith.addf %17, %19 : vector<8x128xf32>
    %c0_12 = arith.constant 0 : index
    %c0_13 = arith.constant 0 : index
    %21 = vector.load %arg2[%c0_12, %c0_13] : memref<8x128xf32, #tpu.memory_space<vmem>>, vector<8x128xf32>
    %22 = arith.truncf %21 : vector<8x128xf32> to vector<8x128xbf16>
    %c2 = arith.constant 2 : index
    %c0_14 = arith.constant 0 : index
    %c0_15 = arith.constant 0 : index
    %23 = vector.load %arg3[%c2, %c0_14, %c0_15] : memref<19x128x128xbf16, #tpu.memory_space<vmem>>, vector<1x128x128xbf16>
    %24 = vector.shape_cast %23 : vector<1x128x128xbf16> to vector<128x128xbf16>
    %cst_16 = arith.constant dense<0.000000e+00> : vector<8x128xf32>
    %25 = tpu.matmul %22, %24, %cst_16 {dimension_numbers = #tpu.dot_dimension_numbers<[1], [0], [0], [1], [0, 0, 1, 1], [], []>} : vector<8x128xbf16>, vector<128x128xbf16>, vector<8x128xf32> -> vector<8x128xf32>
    %c2_17 = arith.constant 2 : index
    %c0_18 = arith.constant 0 : index
    %26 = vector.load %arg4[%c2_17, %c0_18] : memref<17x128xf32, #tpu.memory_space<vmem>>, vector<1x128xf32>
    %27 = vector.broadcast %26 : vector<1x128xf32> to vector<8x128xf32>
    %28 = arith.addf %25, %27 : vector<8x128xf32>
    %29 = arith.truncf %28 : vector<8x128xf32> to vector<8x128xbf16>
    %c3 = arith.constant 3 : index
    %c0_19 = arith.constant 0 : index
    %c0_20 = arith.constant 0 : index
    %30 = vector.load %arg3[%c3, %c0_19, %c0_20] : memref<19x128x128xbf16, #tpu.memory_space<vmem>>, vector<1x128x128xbf16>
    %31 = vector.shape_cast %30 : vector<1x128x128xbf16> to vector<128x128xbf16>
    %cst_21 = arith.constant dense<0.000000e+00> : vector<8x128xf32>
    %32 = tpu.matmul %29, %31, %cst_21 {dimension_numbers = #tpu.dot_dimension_numbers<[1], [0], [0], [1], [0, 0, 1, 1], [], []>} : vector<8x128xbf16>, vector<128x128xbf16>, vector<8x128xf32> -> vector<8x128xf32>
    %c3_22 = arith.constant 3 : index
    %c0_23 = arith.constant 0 : index
    %33 = vector.load %arg4[%c3_22, %c0_23] : memref<17x128xf32, #tpu.memory_space<vmem>>, vector<1x128xf32>
    %34 = vector.broadcast %33 : vector<1x128xf32> to vector<8x128xf32>
    %35 = arith.addf %32, %34 : vector<8x128xf32>
    %36 = arith.negf %35 : vector<8x128xf32>
    %37 = math.exp %36 : vector<8x128xf32>
    %cst_24 = arith.constant 1.000000e+00 : f32
    %38 = vector.broadcast %cst_24 : f32 to vector<8x128xf32>
    %39 = arith.addf %38, %37 : vector<8x128xf32>
    %40 = arith.divf %38, %39 : vector<8x128xf32>
    %41 = arith.mulf %35, %40 : vector<8x128xf32>
    %42 = arith.truncf %20 : vector<8x128xf32> to vector<8x128xbf16>
    %c4 = arith.constant 4 : index
    %c0_25 = arith.constant 0 : index
    %c0_26 = arith.constant 0 : index
    %43 = vector.load %arg3[%c4, %c0_25, %c0_26] : memref<19x128x128xbf16, #tpu.memory_space<vmem>>, vector<1x128x128xbf16>
    %44 = vector.shape_cast %43 : vector<1x128x128xbf16> to vector<128x128xbf16>
    %cst_27 = arith.constant dense<0.000000e+00> : vector<8x128xf32>
    %45 = tpu.matmul %42, %44, %cst_27 {dimension_numbers = #tpu.dot_dimension_numbers<[1], [0], [0], [1], [0, 0, 1, 1], [], []>} : vector<8x128xbf16>, vector<128x128xbf16>, vector<8x128xf32> -> vector<8x128xf32>
    %c4_28 = arith.constant 4 : index
    %c0_29 = arith.constant 0 : index
    %46 = vector.load %arg4[%c4_28, %c0_29] : memref<17x128xf32, #tpu.memory_space<vmem>>, vector<1x128xf32>
    %47 = vector.broadcast %46 : vector<1x128xf32> to vector<8x128xf32>
    %48 = arith.addf %45, %47 : vector<8x128xf32>
    %49 = arith.addf %41, %48 : vector<8x128xf32>
    %50 = arith.truncf %49 : vector<8x128xf32> to vector<8x128xbf16>
    %c5 = arith.constant 5 : index
    %c0_30 = arith.constant 0 : index
    %c0_31 = arith.constant 0 : index
    %51 = vector.load %arg3[%c5, %c0_30, %c0_31] : memref<19x128x128xbf16, #tpu.memory_space<vmem>>, vector<1x128x128xbf16>
    %52 = vector.shape_cast %51 : vector<1x128x128xbf16> to vector<128x128xbf16>
    %cst_32 = arith.constant dense<0.000000e+00> : vector<8x128xf32>
    %53 = tpu.matmul %50, %52, %cst_32 {dimension_numbers = #tpu.dot_dimension_numbers<[1], [0], [0], [1], [0, 0, 1, 1], [], []>} : vector<8x128xbf16>, vector<128x128xbf16>, vector<8x128xf32> -> vector<8x128xf32>
    %c5_33 = arith.constant 5 : index
    %c0_34 = arith.constant 0 : index
    %54 = vector.load %arg4[%c5_33, %c0_34] : memref<17x128xf32, #tpu.memory_space<vmem>>, vector<1x128xf32>
    %55 = vector.broadcast %54 : vector<1x128xf32> to vector<8x128xf32>
    %56 = arith.addf %53, %55 : vector<8x128xf32>
    %57 = arith.negf %56 : vector<8x128xf32>
    %58 = math.exp %57 : vector<8x128xf32>
    %cst_35 = arith.constant 1.000000e+00 : f32
    %59 = vector.broadcast %cst_35 : f32 to vector<8x128xf32>
    %60 = arith.addf %59, %58 : vector<8x128xf32>
    %61 = arith.divf %59, %60 : vector<8x128xf32>
    %62 = arith.mulf %56, %61 : vector<8x128xf32>
    %c0_36 = arith.constant 0 : index
    %c0_37 = arith.constant 0 : index
    %c0_38 = arith.constant 0 : index
    %63 = vector.load %arg6[%c0_36, %c0_37, %c0_38] : memref<2x8x128xf32, #tpu.memory_space<vmem>>, vector<1x8x128xf32>
    %64 = vector.shape_cast %63 : vector<1x8x128xf32> to vector<8x128xf32>
    %65 = vector.shape_cast %62 : vector<8x128xf32> to vector<1x8x128xf32>
    tpu.vector_store %arg6[%c0_36, %c0_37, %c0_38], %65 {strides = array<i32>} : memref<2x8x128xf32, #tpu.memory_space<vmem>>, vector<1x8x128xf32>,
    %66 = arith.truncf %62 : vector<8x128xf32> to vector<8x128xbf16>
    %c6 = arith.constant 6 : index
    %c0_39 = arith.constant 0 : index
    %c0_40 = arith.constant 0 : index
    %67 = vector.load %arg3[%c6, %c0_39, %c0_40] : memref<19x128x128xbf16, #tpu.memory_space<vmem>>, vector<1x128x128xbf16>
    %68 = vector.shape_cast %67 : vector<1x128x128xbf16> to vector<128x128xbf16>
    %cst_41 = arith.constant dense<0.000000e+00> : vector<8x128xf32>
    %69 = tpu.matmul %66, %68, %cst_41 {dimension_numbers = #tpu.dot_dimension_numbers<[1], [0], [0], [1], [0, 0, 1, 1], [], []>} : vector<8x128xbf16>, vector<128x128xbf16>, vector<8x128xf32> -> vector<8x128xf32>
    %c6_42 = arith.constant 6 : index
    %c0_43 = arith.constant 0 : index
    %70 = vector.load %arg4[%c6_42, %c0_43] : memref<17x128xf32, #tpu.memory_space<vmem>>, vector<1x128xf32>
    %71 = vector.broadcast %70 : vector<1x128xf32> to vector<8x128xf32>
    %72 = arith.addf %69, %71 : vector<8x128xf32>
    %73 = arith.negf %72 : vector<8x128xf32>
    %74 = math.exp %73 : vector<8x128xf32>
    %cst_44 = arith.constant 1.000000e+00 : f32
    %75 = vector.broadcast %cst_44 : f32 to vector<8x128xf32>
    %76 = arith.addf %75, %74 : vector<8x128xf32>
    %77 = arith.divf %75, %76 : vector<8x128xf32>
    %78 = arith.mulf %72, %77 : vector<8x128xf32>
    %79 = arith.truncf %20 : vector<8x128xf32> to vector<8x128xbf16>
    %c7 = arith.constant 7 : index
    %c0_45 = arith.constant 0 : index
    %c0_46 = arith.constant 0 : index
    %80 = vector.load %arg3[%c7, %c0_45, %c0_46] : memref<19x128x128xbf16, #tpu.memory_space<vmem>>, vector<1x128x128xbf16>
    %81 = vector.shape_cast %80 : vector<1x128x128xbf16> to vector<128x128xbf16>
    %cst_47 = arith.constant dense<0.000000e+00> : vector<8x128xf32>
    %82 = tpu.matmul %79, %81, %cst_47 {dimension_numbers = #tpu.dot_dimension_numbers<[1], [0], [0], [1], [0, 0, 1, 1], [], []>} : vector<8x128xbf16>, vector<128x128xbf16>, vector<8x128xf32> -> vector<8x128xf32>
    %c7_48 = arith.constant 7 : index
    %c0_49 = arith.constant 0 : index
    %83 = vector.load %arg4[%c7_48, %c0_49] : memref<17x128xf32, #tpu.memory_space<vmem>>, vector<1x128xf32>
    %84 = vector.broadcast %83 : vector<1x128xf32> to vector<8x128xf32>
    %85 = arith.addf %82, %84 : vector<8x128xf32>
    %86 = arith.addf %78, %85 : vector<8x128xf32>
    %87 = arith.truncf %86 : vector<8x128xf32> to vector<8x128xbf16>
    %c8 = arith.constant 8 : index
    %c0_50 = arith.constant 0 : index
    %c0_51 = arith.constant 0 : index
    %88 = vector.load %arg3[%c8, %c0_50, %c0_51] : memref<19x128x128xbf16, #tpu.memory_space<vmem>>, vector<1x128x128xbf16>
    %89 = vector.shape_cast %88 : vector<1x128x128xbf16> to vector<128x128xbf16>
    %cst_52 = arith.constant dense<0.000000e+00> : vector<8x128xf32>
    %90 = tpu.matmul %87, %89, %cst_52 {dimension_numbers = #tpu.dot_dimension_numbers<[1], [0], [0], [1], [0, 0, 1, 1], [], []>} : vector<8x128xbf16>, vector<128x128xbf16>, vector<8x128xf32> -> vector<8x128xf32>
    %c8_53 = arith.constant 8 : index
    %c0_54 = arith.constant 0 : index
    %91 = vector.load %arg4[%c8_53, %c0_54] : memref<17x128xf32, #tpu.memory_space<vmem>>, vector<1x128xf32>
    %92 = vector.broadcast %91 : vector<1x128xf32> to vector<8x128xf32>
    %93 = arith.addf %90, %92 : vector<8x128xf32>
    %94 = arith.negf %93 : vector<8x128xf32>
    %95 = math.exp %94 : vector<8x128xf32>
    %cst_55 = arith.constant 1.000000e+00 : f32
    %96 = vector.broadcast %cst_55 : f32 to vector<8x128xf32>
    %97 = arith.addf %96, %95 : vector<8x128xf32>
    %98 = arith.divf %96, %97 : vector<8x128xf32>
    %99 = arith.mulf %93, %98 : vector<8x128xf32>
    %c1_56 = arith.constant 1 : index
    %c0_57 = arith.constant 0 : index
    %c0_58 = arith.constant 0 : index
    %100 = vector.load %arg6[%c1_56, %c0_57, %c0_58] : memref<2x8x128xf32, #tpu.memory_space<vmem>>, vector<1x8x128xf32>
    %101 = vector.shape_cast %100 : vector<1x8x128xf32> to vector<8x128xf32>
    %102 = vector.shape_cast %99 : vector<8x128xf32> to vector<1x8x128xf32>
    tpu.vector_store %arg6[%c1_56, %c0_57, %c0_58], %102 {strides = array<i32>} : memref<2x8x128xf32, #tpu.memory_space<vmem>>, vector<1x8x128xf32>,
    %103 = arith.truncf %99 : vector<8x128xf32> to vector<8x128xbf16>
    %c9 = arith.constant 9 : index
    %c0_59 = arith.constant 0 : index
    %c0_60 = arith.constant 0 : index
    %104 = vector.load %arg3[%c9, %c0_59, %c0_60] : memref<19x128x128xbf16, #tpu.memory_space<vmem>>, vector<1x128x128xbf16>
    %105 = vector.shape_cast %104 : vector<1x128x128xbf16> to vector<128x128xbf16>
    %cst_61 = arith.constant dense<0.000000e+00> : vector<8x128xf32>
    %106 = tpu.matmul %103, %105, %cst_61 {dimension_numbers = #tpu.dot_dimension_numbers<[1], [0], [0], [1], [0, 0, 1, 1], [], []>} : vector<8x128xbf16>, vector<128x128xbf16>, vector<8x128xf32> -> vector<8x128xf32>
    %c9_62 = arith.constant 9 : index
    %c0_63 = arith.constant 0 : index
    %107 = vector.load %arg4[%c9_62, %c0_63] : memref<17x128xf32, #tpu.memory_space<vmem>>, vector<1x128xf32>
    %108 = vector.broadcast %107 : vector<1x128xf32> to vector<8x128xf32>
    %109 = arith.addf %106, %108 : vector<8x128xf32>
    %c1_64 = arith.constant 1 : index
    %c0_65 = arith.constant 0 : index
    %c0_66 = arith.constant 0 : index
    %110 = vector.load %arg6[%c1_64, %c0_65, %c0_66] : memref<2x8x128xf32, #tpu.memory_space<vmem>>, vector<1x8x128xf32>
    %111 = vector.shape_cast %110 : vector<1x8x128xf32> to vector<8x128xf32>
    %112 = tpu.concatenate %111, %109 in 1 : vector<8x128xf32>, vector<8x128xf32> -> vector<8x256xf32>
    %113 = arith.truncf %112 : vector<8x256xf32> to vector<8x256xbf16>
    %c10 = arith.constant 10 : index
    %c0_67 = arith.constant 0 : index
    %c0_68 = arith.constant 0 : index
    %114 = vector.load %arg3[%c10, %c0_67, %c0_68] : memref<19x128x128xbf16, #tpu.memory_space<vmem>>, vector<1x128x128xbf16>
    %115 = vector.shape_cast %114 : vector<1x128x128xbf16> to vector<128x128xbf16>
    %c11 = arith.constant 11 : index
    %c0_69 = arith.constant 0 : index
    %c0_70 = arith.constant 0 : index
    %116 = vector.load %arg3[%c11, %c0_69, %c0_70] : memref<19x128x128xbf16, #tpu.memory_space<vmem>>, vector<1x128x128xbf16>
    %117 = vector.shape_cast %116 : vector<1x128x128xbf16> to vector<128x128xbf16>
    %118 = tpu.concatenate %115, %117 in 0 : vector<128x128xbf16>, vector<128x128xbf16> -> vector<256x128xbf16>
    %cst_71 = arith.constant dense<0.000000e+00> : vector<8x128xf32>
    %119 = tpu.matmul %113, %118, %cst_71 {dimension_numbers = #tpu.dot_dimension_numbers<[1], [0], [0], [1], [0, 0, 1, 1], [], []>} : vector<8x256xbf16>, vector<256x128xbf16>, vector<8x128xf32> -> vector<8x128xf32>
    %c10_72 = arith.constant 10 : index
    %c0_73 = arith.constant 0 : index
    %120 = vector.load %arg4[%c10_72, %c0_73] : memref<17x128xf32, #tpu.memory_space<vmem>>, vector<1x128xf32>
    %121 = vector.broadcast %120 : vector<1x128xf32> to vector<8x128xf32>
    %122 = arith.addf %119, %121 : vector<8x128xf32>
    %123 = arith.negf %122 : vector<8x128xf32>
    %124 = math.exp %123 : vector<8x128xf32>
    %cst_74 = arith.constant 1.000000e+00 : f32
    %125 = vector.broadcast %cst_74 : f32 to vector<8x128xf32>
    %126 = arith.addf %125, %124 : vector<8x128xf32>
    %127 = arith.divf %125, %126 : vector<8x128xf32>
    %128 = arith.mulf %122, %127 : vector<8x128xf32>
    %129 = arith.truncf %20 : vector<8x128xf32> to vector<8x128xbf16>
    %c12 = arith.constant 12 : index
    %c0_75 = arith.constant 0 : index
    %c0_76 = arith.constant 0 : index
    %130 = vector.load %arg3[%c12, %c0_75, %c0_76] : memref<19x128x128xbf16, #tpu.memory_space<vmem>>, vector<1x128x128xbf16>
    %131 = vector.shape_cast %130 : vector<1x128x128xbf16> to vector<128x128xbf16>
    %cst_77 = arith.constant dense<0.000000e+00> : vector<8x128xf32>
    %132 = tpu.matmul %129, %131, %cst_77 {dimension_numbers = #tpu.dot_dimension_numbers<[1], [0], [0], [1], [0, 0, 1, 1], [], []>} : vector<8x128xbf16>, vector<128x128xbf16>, vector<8x128xf32> -> vector<8x128xf32>
    %c11_78 = arith.constant 11 : index
    %c0_79 = arith.constant 0 : index
    %133 = vector.load %arg4[%c11_78, %c0_79] : memref<17x128xf32, #tpu.memory_space<vmem>>, vector<1x128xf32>
    %134 = vector.broadcast %133 : vector<1x128xf32> to vector<8x128xf32>
    %135 = arith.addf %132, %134 : vector<8x128xf32>
    %136 = arith.addf %128, %135 : vector<8x128xf32>
    %137 = arith.truncf %136 : vector<8x128xf32> to vector<8x128xbf16>
    %c13 = arith.constant 13 : index
    %c0_80 = arith.constant 0 : index
    %c0_81 = arith.constant 0 : index
    %138 = vector.load %arg3[%c13, %c0_80, %c0_81] : memref<19x128x128xbf16, #tpu.memory_space<vmem>>, vector<1x128x128xbf16>
    %139 = vector.shape_cast %138 : vector<1x128x128xbf16> to vector<128x128xbf16>
    %cst_82 = arith.constant dense<0.000000e+00> : vector<8x128xf32>
    %140 = tpu.matmul %137, %139, %cst_82 {dimension_numbers = #tpu.dot_dimension_numbers<[1], [0], [0], [1], [0, 0, 1, 1], [], []>} : vector<8x128xbf16>, vector<128x128xbf16>, vector<8x128xf32> -> vector<8x128xf32>
    %c12_83 = arith.constant 12 : index
    %c0_84 = arith.constant 0 : index
    %141 = vector.load %arg4[%c12_83, %c0_84] : memref<17x128xf32, #tpu.memory_space<vmem>>, vector<1x128xf32>
    %142 = vector.broadcast %141 : vector<1x128xf32> to vector<8x128xf32>
    %143 = arith.addf %140, %142 : vector<8x128xf32>
    %144 = arith.negf %143 : vector<8x128xf32>
    %145 = math.exp %144 : vector<8x128xf32>
    %cst_85 = arith.constant 1.000000e+00 : f32
    %146 = vector.broadcast %cst_85 : f32 to vector<8x128xf32>
    %147 = arith.addf %146, %145 : vector<8x128xf32>
    %148 = arith.divf %146, %147 : vector<8x128xf32>
    %149 = arith.mulf %143, %148 : vector<8x128xf32>
    %c0_86 = arith.constant 0 : index
    %c0_87 = arith.constant 0 : index
    %c0_88 = arith.constant 0 : index
    %150 = vector.load %arg6[%c0_86, %c0_87, %c0_88] : memref<2x8x128xf32, #tpu.memory_space<vmem>>, vector<1x8x128xf32>
    %151 = vector.shape_cast %150 : vector<1x8x128xf32> to vector<8x128xf32>
    %152 = tpu.concatenate %151, %149 in 1 : vector<8x128xf32>, vector<8x128xf32> -> vector<8x256xf32>
    %153 = arith.truncf %152 : vector<8x256xf32> to vector<8x256xbf16>
    %c14 = arith.constant 14 : index
    %c0_89 = arith.constant 0 : index
    %c0_90 = arith.constant 0 : index
    %154 = vector.load %arg3[%c14, %c0_89, %c0_90] : memref<19x128x128xbf16, #tpu.memory_space<vmem>>, vector<1x128x128xbf16>
    %155 = vector.shape_cast %154 : vector<1x128x128xbf16> to vector<128x128xbf16>
    %c15 = arith.constant 15 : index
    %c0_91 = arith.constant 0 : index
    %c0_92 = arith.constant 0 : index
    %156 = vector.load %arg3[%c15, %c0_91, %c0_92] : memref<19x128x128xbf16, #tpu.memory_space<vmem>>, vector<1x128x128xbf16>
    %157 = vector.shape_cast %156 : vector<1x128x128xbf16> to vector<128x128xbf16>
    %158 = tpu.concatenate %155, %157 in 0 : vector<128x128xbf16>, vector<128x128xbf16> -> vector<256x128xbf16>
    %cst_93 = arith.constant dense<0.000000e+00> : vector<8x128xf32>
    %159 = tpu.matmul %153, %158, %cst_93 {dimension_numbers = #tpu.dot_dimension_numbers<[1], [0], [0], [1], [0, 0, 1, 1], [], []>} : vector<8x256xbf16>, vector<256x128xbf16>, vector<8x128xf32> -> vector<8x128xf32>
    %c13_94 = arith.constant 13 : index
    %c0_95 = arith.constant 0 : index
    %160 = vector.load %arg4[%c13_94, %c0_95] : memref<17x128xf32, #tpu.memory_space<vmem>>, vector<1x128xf32>
    %161 = vector.broadcast %160 : vector<1x128xf32> to vector<8x128xf32>
    %162 = arith.addf %159, %161 : vector<8x128xf32>
    %163 = arith.negf %162 : vector<8x128xf32>
    %164 = math.exp %163 : vector<8x128xf32>
    %cst_96 = arith.constant 1.000000e+00 : f32
    %165 = vector.broadcast %cst_96 : f32 to vector<8x128xf32>
    %166 = arith.addf %165, %164 : vector<8x128xf32>
    %167 = arith.divf %165, %166 : vector<8x128xf32>
    %168 = arith.mulf %162, %167 : vector<8x128xf32>
    %169 = arith.truncf %20 : vector<8x128xf32> to vector<8x128xbf16>
    %c16 = arith.constant 16 : index
    %c0_97 = arith.constant 0 : index
    %c0_98 = arith.constant 0 : index
    %170 = vector.load %arg3[%c16, %c0_97, %c0_98] : memref<19x128x128xbf16, #tpu.memory_space<vmem>>, vector<1x128x128xbf16>
    %171 = vector.shape_cast %170 : vector<1x128x128xbf16> to vector<128x128xbf16>
    %cst_99 = arith.constant dense<0.000000e+00> : vector<8x128xf32>
    %172 = tpu.matmul %169, %171, %cst_99 {dimension_numbers = #tpu.dot_dimension_numbers<[1], [0], [0], [1], [0, 0, 1, 1], [], []>} : vector<8x128xbf16>, vector<128x128xbf16>, vector<8x128xf32> -> vector<8x128xf32>
    %c14_100 = arith.constant 14 : index
    %c0_101 = arith.constant 0 : index
    %173 = vector.load %arg4[%c14_100, %c0_101] : memref<17x128xf32, #tpu.memory_space<vmem>>, vector<1x128xf32>
    %174 = vector.broadcast %173 : vector<1x128xf32> to vector<8x128xf32>
    %175 = arith.addf %172, %174 : vector<8x128xf32>
    %176 = arith.addf %168, %175 : vector<8x128xf32>
    %177 = arith.truncf %176 : vector<8x128xf32> to vector<8x128xbf16>
    %c17 = arith.constant 17 : index
    %c0_102 = arith.constant 0 : index
    %c0_103 = arith.constant 0 : index
    %178 = vector.load %arg3[%c17, %c0_102, %c0_103] : memref<19x128x128xbf16, #tpu.memory_space<vmem>>, vector<1x128x128xbf16>
    %179 = vector.shape_cast %178 : vector<1x128x128xbf16> to vector<128x128xbf16>
    %cst_104 = arith.constant dense<0.000000e+00> : vector<8x128xf32>
    %180 = tpu.matmul %177, %179, %cst_104 {dimension_numbers = #tpu.dot_dimension_numbers<[1], [0], [0], [1], [0, 0, 1, 1], [], []>} : vector<8x128xbf16>, vector<128x128xbf16>, vector<8x128xf32> -> vector<8x128xf32>
    %c15_105 = arith.constant 15 : index
    %c0_106 = arith.constant 0 : index
    %181 = vector.load %arg4[%c15_105, %c0_106] : memref<17x128xf32, #tpu.memory_space<vmem>>, vector<1x128xf32>
    %182 = vector.broadcast %181 : vector<1x128xf32> to vector<8x128xf32>
    %183 = arith.addf %180, %182 : vector<8x128xf32>
    %184 = arith.negf %183 : vector<8x128xf32>
    %185 = math.exp %184 : vector<8x128xf32>
    %cst_107 = arith.constant 1.000000e+00 : f32
    %186 = vector.broadcast %cst_107 : f32 to vector<8x128xf32>
    %187 = arith.addf %186, %185 : vector<8x128xf32>
    %188 = arith.divf %186, %187 : vector<8x128xf32>
    %189 = arith.mulf %183, %188 : vector<8x128xf32>
    %190 = arith.truncf %189 : vector<8x128xf32> to vector<8x128xbf16>
    %c18 = arith.constant 18 : index
    %c0_108 = arith.constant 0 : index
    %c0_109 = arith.constant 0 : index
    %191 = vector.load %arg3[%c18, %c0_108, %c0_109] : memref<19x128x128xbf16, #tpu.memory_space<vmem>>, vector<1x128x128xbf16>
    %192 = vector.shape_cast %191 : vector<1x128x128xbf16> to vector<128x128xbf16>
    %cst_110 = arith.constant dense<0.000000e+00> : vector<8x128xf32>
    %193 = tpu.matmul %190, %192, %cst_110 {dimension_numbers = #tpu.dot_dimension_numbers<[1], [0], [0], [1], [0, 0, 1, 1], [], []>} : vector<8x128xbf16>, vector<128x128xbf16>, vector<8x128xf32> -> vector<8x128xf32>
    %c16_111 = arith.constant 16 : index
    %c0_112 = arith.constant 0 : index
    %194 = vector.load %arg4[%c16_111, %c0_112] : memref<17x128xf32, #tpu.memory_space<vmem>>, vector<1x128xf32>
    %195 = vector.broadcast %194 : vector<1x128xf32> to vector<8x128xf32>
    %196 = arith.addf %193, %195 : vector<8x128xf32>
    %c0_113 = arith.constant 0 : index
    %c0_114 = arith.constant 0 : index
    %197 = vector.load %arg5[%c0_113, %c0_114] : memref<8x128xf32, #tpu.memory_space<vmem>>, vector<8x128xf32>
    tpu.vector_store %arg5[%c0_113, %c0_114], %196 {strides = array<i32>} : memref<8x128xf32, #tpu.memory_space<vmem>>, vector<8x128xf32>,
    return
  }
  func.func @transform_0(%arg0: i32) -> (i32, i32) {
    %c0_i32 = arith.constant 0 : i32
    %c0_i32_0 = arith.constant 0 : i32
    return %arg0, %c0_i32 : i32, i32
  }
  func.func @transform_1(%arg0: i32) -> (i32, i32) {
    %c0_i32 = arith.constant 0 : i32
    %c0_i32_0 = arith.constant 0 : i32
    return %arg0, %c0_i32 : i32, i32
  }
  func.func @transform_2(%arg0: i32) -> (i32, i32, i32) {
    %c0_i32 = arith.constant 0 : i32
    %c0_i32_0 = arith.constant 0 : i32
    %c0_i32_1 = arith.constant 0 : i32
    %c0_i32_2 = arith.constant 0 : i32
    return %c0_i32, %c0_i32_0, %c0_i32_1 : i32, i32, i32
  }
  func.func @transform_3(%arg0: i32) -> (i32, i32) {
    %c0_i32 = arith.constant 0 : i32
    %c0_i32_0 = arith.constant 0 : i32
    %c0_i32_1 = arith.constant 0 : i32
    return %c0_i32, %c0_i32_0 : i32, i32
  }
  func.func @transform_4(%arg0: i32) -> (i32, i32) {
    %c0_i32 = arith.constant 0 : i32
    %c0_i32_0 = arith.constant 0 : i32
    return %arg0, %c0_i32 : i32, i32
  }
}

</mosaic_0001>

<bundles_post_ra>
// kernel: sgm_forward.1
= control target key start
LH: loop header
LB: loop body
LE: loop exit
PB: predicated region body
PF: predicated region fallthrough
CT: control target
= control target key end

     0   :  { %9 = vsyncpa [#allocation4], 0  ;;  %s3309_s0 = inlined_call_operand.vmem [shape: f32[8,128], index: 0, kind: input, shape index: {}]   ;;  %s3310_s1 = inlined_call_operand.vmem [shape: f32[8,128], index: 1, kind: input, shape index: {}]   ;;  %s3311_s2 = inlined_call_operand.hbm [shape: bf16[19,128,128], index: 2, kind: input, shape index: {}]   ;;  %s3312_s3 = inlined_call_operand.vmem [shape: f32[17,128], index: 3, kind: input, shape index: {}]   ;;  %s3313_s4 = inlined_call_operand.hbm [shape: f32[8,128], index: 4, kind: output, shape index: {}]  }
   0x1   :  { %10 = vsyncpa [#allocation5], 0  ;;  %s3037_s15 = smov [#allocation3]   ;;  %s2989_s19 = scalar_lea.hbm %s3311_s2, 19456 }
   0x2   :  { %s20_s16 = sshll.u32 %s3037_s15, 4  ;;  %p2990_p0 = scmp.ne.s32.totalorder %s3311_s2, %s2989_s19  ;;  %s21_s16 = int_to_ptr.vmem [resolvable:$true] %s20_s16 }
   0x3   :  { %p2993_p1 = scmp.lt.u32.totalorder %s2989_s19, %s3311_s2 }
   0x5   :  { %p2995_p2 = pnand %p2993_p1, %p2990_p0 }
   0x7   :  { %2998 = shalt.err (!%p2995_p2)
}
   0x8   :  { %s2999_s24 = scalar_lea.vmem %s21_s16, 19456  ;;  %p3004_p4 = scmp.lt.s32.totalorder %s21_s16, %s21_s16 }
   0x9   :  { %p3000_p3 = scmp.ne.s32.totalorder %s21_s16, %s2999_s24  ;;  %p3005_p5 = scmp.lt.s32.totalorder %s2999_s24, %s2999_s24 }
   0xb   :  { %p3006_p6 = por %p3005_p5, %p3004_p4 }
   0xd   :  { %p3007_p7 = pnand %p3006_p6, %p3000_p3 }
   0xf   :  { %3010 = shalt.err (!%p3007_p7)
}
  0x10   :  { %s3038_s25 = smov 64   ;;  %s3039_s26 = smov 4  }
  0x11   :  { %26 = dma.hbm_to_vmem [thread:$0]  %s3311_s2, 19456, %s21_s16, [#allocation4], %s3038_s25, %s3038_s25, %s3039_s26  }
  0x12   :  { %3033 = dma.done.wait [#allocation4], 19456  }
  0x13   :  { %3034 = vsyncadd [#allocation4], 4294947840  ;;  %v3040_v0 = vmov 0.0   ;;  %vm3041_vm0 = vmmov 0   ;;  %v2801_v1 = vld [vmem:[#allocation3] sm:$0xff]   ;;  %v2802_v2 = vld [vmem:[#allocation3 + $0x8] sm:$0xff]  }
  0x14   :  { %2495 = vmatprep.subr.bf16.mxu0 %v3040_v0  ;;  %2511 = vmatprep.mubr.msk.bf16.mxu0 %vm3041_vm0, %v3040_v0  ;;  %v2803_v3 = vld [vmem:[#allocation3 + $0x10] sm:$0xff]   ;;  %v2804_v4 = vld [vmem:[#allocation3 + $0x18] sm:$0xff]   ;;  %v2805_v5 = vld [vmem:[#allocation3 + $0x20] sm:$0xff]   ;;  %s3042_s9 = smov [#allocation6]  }
  0x15   :  { %2515 = vmatprep.subr.bf16.mxu1 %v3040_v0  ;;  %2531 = vmatprep.mubr.msk.bf16.mxu1 %vm3041_vm0, %v3040_v0  ;;  %v2806_v6 = vld [vmem:[#allocation3 + $0x28] sm:$0xff]   ;;  %v2807_v7 = vld [vmem:[#allocation3 + $0x30] sm:$0xff]   ;;  %v2808_v8 = vld [vmem:[#allocation3 + $0x38] sm:$0xff]   ;;  %s2129_s10 = sshll.u32 %s3042_s9, 4  ;;  %s2130_s10 = int_to_ptr.vmem [resolvable:$true] %s2129_s10 }
  0x16   :  { %2496 = vmatpush3.bf16.msra.mxu0 %v2801_v1  ;;  %v33_v9 = vld [vmem:[%s3309_s0] sm:$0xff]  ;;  %v2810_v12 = vld [vmem:[#allocation3 + $0x88] sm:$0xff]   ;;  %v2811_v13 = vld [vmem:[#allocation3 + $0x90] sm:$0xff]   ;;  %s3011_s11 = scalar_lea.vmem %s2130_s10, 128  ;;  %p3016_p9 = scmp.lt.s32.totalorder %s2130_s10, %s2130_s10 }
  0x17   :  { %2497 = vmatprep.subr.bf16.mxu0 %v3040_v0  ;;  %v2809_v10 = vld [vmem:[#allocation3 + $0x80] sm:$0xff]   ;;  %v34_v11 = vpack.c.bf16 %v33_v9, %v33_v9  ;;  %v2812_v14 = vld [vmem:[#allocation3 + $0x98] sm:$0xff]   ;;  %v2814_v16 = vld [vmem:[#allocation3 + $0xa8] sm:$0xff]   ;;  %p3012_p8 = scmp.ne.s32.totalorder %s2130_s10, %s3011_s11  ;;  %p3017_p10 = scmp.lt.s32.totalorder %s3011_s11, %s3011_s11 }
  0x18   :  { %v2813_v15 = vld [vmem:[#allocation3 + $0xa0] sm:$0xff]   ;;  %v2815_v17 = vld [vmem:[#allocation3 + $0xb0] sm:$0xff]   ;;  %v2816_v18 = vld [vmem:[#allocation3 + $0xb8] sm:$0xff]  }
  0x19   :  { %v262_v19 = vld [vmem:[%s3310_s1] sm:$0xff]  ;;  %v2818_v22 = vld [vmem:[#allocation3 + $0x48] sm:$0xff]   ;;  %v2819_v23 = vld [vmem:[#allocation3 + $0x50] sm:$0xff]   ;;  %p3018_p11 = por %p3017_p10, %p3016_p9 }
  0x1a   :  { %2498 = vmatpush3.bf16.msra.mxu0 %v2802_v2  ;;  %v263_v20 = vpack.c.bf16 %v262_v19, %v262_v19  ;;  %v2817_v21 = vld [vmem:[#allocation3 + $0x40] sm:$0xff]   ;;  %v2820_v24 = vld [vmem:[#allocation3 + $0x58] sm:$0xff]   ;;  %v2822_v26 = vld [vmem:[#allocation3 + $0x68] sm:$0xff]  }
  0x1b   :  { %2499 = vmatprep.subr.bf16.mxu0 %v3040_v0  ;;  %2516 = vmatpush3.bf16.msra.mxu1 %v2817_v21  ;;  %v2821_v25 = vld [vmem:[#allocation3 + $0x60] sm:$0xff]   ;;  %v2823_v27 = vld [vmem:[#allocation3 + $0x70] sm:$0xff]   ;;  %v2824_v28 = vld [vmem:[#allocation3 + $0x78] sm:$0xff]   ;;  %p3019_p12 = pnand %p3018_p11, %p3012_p8 }
  0x1c   :  { %2517 = vmatprep.subr.bf16.mxu1 %v3040_v0  ;;  %v2833_v29 = vld [vmem:[#allocation3 + $0x100] sm:$0xff]   ;;  %v2834_v30 = vld [vmem:[#allocation3 + $0x108] sm:$0xff]   ;;  %v2835_v31 = vld [vmem:[#allocation3 + $0x110] sm:$0xff]  }
  0x1d   :  { %v2836_v32 = vld [vmem:[#allocation3 + $0x118] sm:$0xff]   ;;  %v2837_v33 = vld [vmem:[#allocation3 + $0x120] sm:$0xff]   ;;  %v2838_v34 = vld [vmem:[#allocation3 + $0x128] sm:$0xff]  }
  0x1e   :  { %2500 = vmatpush3.bf16.msra.mxu0 %v2803_v3  ;;  %v2839_v35 = vld [vmem:[#allocation3 + $0x130] sm:$0xff]   ;;  %v2138_v36 = vld [vmem:[%s3312_s3] ss:$0 sm:$0xff]  ;;  %v2826_v51 = vld [vmem:[#allocation3 + $0xc8] sm:$0xff]  }
  0x1f   :  { %2501 = vmatprep.subr.bf16.mxu0 %v3040_v0  ;;  %2518 = vmatpush3.bf16.msra.mxu1 %v2818_v22  ;;  %v2825_v47 = vld [vmem:[#allocation3 + $0xc0] sm:$0xff]   ;;  %v2827_v54 = vld [vmem:[#allocation3 + $0xd0] sm:$0xff]   ;;  %v2828_v55 = vld [vmem:[#allocation3 + $0xd8] sm:$0xff]  }
  0x20   :  { %2519 = vmatprep.subr.bf16.mxu1 %v3040_v0  ;;  %v2829_v56 = vld [vmem:[#allocation3 + $0xe0] sm:$0xff]   ;;  %v2830_v57 = vld [vmem:[#allocation3 + $0xe8] sm:$0xff]   ;;  %v2831_v58 = vld [vmem:[#allocation3 + $0xf0] sm:$0xff]  }
  0x21   :  { %v2157_v59 = vld [vmem:[%s3312_s3 + $0x2] ss:$0 sm:$0xff]  ;;  %v2832_v61 = vld [vmem:[#allocation3 + $0xf8] sm:$0xff]   ;;  %v2842_v2 = vld [vmem:[#allocation3 + $0x148] sm:$0xff]  }
  0x22   :  { %2502 = vmatpush3.bf16.msra.mxu0 %v2804_v4  ;;  %v2840_v63 = vld [vmem:[#allocation3 + $0x138] sm:$0xff]   ;;  %v2841_v1 = vld [vmem:[#allocation3 + $0x140] sm:$0xff]   ;;  %v2843_v3 = vld [vmem:[#allocation3 + $0x150] sm:$0xff]  }
  0x23   :  { %2503 = vmatprep.subr.bf16.mxu0 %v3040_v0  ;;  %2520 = vmatpush3.bf16.msra.mxu1 %v2819_v23  ;;  %v2844_v4 = vld [vmem:[#allocation3 + $0x158] sm:$0xff]  }
  0x24   :  { %2521 = vmatprep.subr.bf16.mxu1 %v3040_v0  ;;  %v2848_v19 = vld [vmem:[#allocation3 + $0x178] sm:$0xff]  }
  0x26   :  { %2504 = vmatpush3.bf16.msra.mxu0 %v2805_v5  ;;  %v2845_v5 = vld [vmem:[#allocation3 + $0x160] sm:$0xff]  }
  0x27   :  { %2505 = vmatprep.subr.bf16.mxu0 %v3040_v0  ;;  %2522 = vmatpush3.bf16.msra.mxu1 %v2820_v24 }
  0x28   :  { %2523 = vmatprep.subr.bf16.mxu1 %v3040_v0 }
  0x2a   :  { %2506 = vmatpush3.bf16.msra.mxu0 %v2806_v6  ;;  %v2846_v6 = vld [vmem:[#allocation3 + $0x168] sm:$0xff]  }
  0x2b   :  { %2507 = vmatprep.subr.bf16.mxu0 %v3040_v0  ;;  %2524 = vmatpush3.bf16.msra.mxu1 %v2821_v25 }
  0x2c   :  { %2525 = vmatprep.subr.bf16.mxu1 %v3040_v0 }
  0x2e   :  { %2508 = vmatpush3.bf16.msra.mxu0 %v2807_v7  ;;  %v2847_v7 = vld [vmem:[#allocation3 + $0x170] sm:$0xff]  }
  0x2f   :  { %2509 = vmatprep.subr.bf16.mxu0 %v3040_v0  ;;  %2526 = vmatpush3.bf16.msra.mxu1 %v2822_v26  ;;  %v2176_v26 = vld [vmem:[%s3312_s3 + $0x4] ss:$0 sm:$0xff] }
  0x30   :  { %2527 = vmatprep.subr.bf16.mxu1 %v3040_v0 }
  0x32   :  { %2510 = vmatpush3.bf16.msra.mxu0 %v2808_v8  ;;  %v2148_v8 = vld [vmem:[%s3312_s3 + $0x1] ss:$0 sm:$0xff] }
  0x33   :  { %2535 = vmatprep.subr.bf16.mxu0 %v3040_v0  ;;  %2528 = vmatpush3.bf16.msra.mxu1 %v2823_v27 }
  0x34   :  { %2529 = vmatprep.subr.bf16.mxu1 %v3040_v0 }
  0x35   :  { %2512 = vmatmul.mubr.bf16.vlgmr.msra.gmra.mrb[0].mxu0 %v34_v11 }
  0x36   :  { %2536 = vmatpush3.bf16.msra.mxu0 %v2809_v10  ;;  %2551 = vmatprep.mubr.msk.bf16.mxu0 %vm3041_vm0, %v3040_v0 }
  0x37   :  { %2537 = vmatprep.subr.bf16.mxu0 %v3040_v0  ;;  %2530 = vmatpush3.bf16.msra.mxu1 %v2824_v28 }
  0x38   :  { %2555 = vmatprep.subr.bf16.mxu1 %v3040_v0 }
  0x3a   :  { %2538 = vmatpush3.bf16.msra.mxu0 %v2810_v12 }
  0x3b   :  { %2539 = vmatprep.subr.bf16.mxu0 %v3040_v0 }
  0x3e   :  { %2540 = vmatpush3.bf16.msra.mxu0 %v2811_v13 }
  0x3f   :  { %2541 = vmatprep.subr.bf16.mxu0 %v3040_v0 }
  0x42   :  { %2542 = vmatpush3.bf16.msra.mxu0 %v2812_v14 }
  0x43   :  { %2543 = vmatprep.subr.bf16.mxu0 %v3040_v0 }
  0x46   :  { %2544 = vmatpush3.bf16.msra.mxu0 %v2813_v15 }
  0x47   :  { %2545 = vmatprep.subr.bf16.mxu0 %v3040_v0 }
  0x4a   :  { %2546 = vmatpush3.bf16.msra.mxu0 %v2814_v16 }
  0x4b   :  { %2547 = vmatprep.subr.bf16.mxu0 %v3040_v0 }
  0x4e   :  { %2548 = vmatpush3.bf16.msra.mxu0 %v2815_v17 }
  0x4f   :  { %2549 = vmatprep.subr.bf16.mxu0 %v3040_v0 }
  0x52   :  { %2550 = vmatpush3.bf16.msra.mxu0 %v2816_v18 }
  0x53   :  { %2575 = vmatprep.subr.bf16.mxu0 %v3040_v0 }
  0x55   :  { %2552 = vmatmul.mubr.bf16.vlgmr.msra.gmra.mrb[4].mxu0 %v263_v20  ;;  %v2166_v20 = vld [vmem:[%s3312_s3 + $0x3] ss:$0 sm:$0xff] }
  0x56   :  { %2591 = vmatprep.mubr.msk.bf16.mxu0 %vm3041_vm0, %v3040_v0  ;;  %2576 = vmatpush3.bf16.msra.mxu0 %v2833_v29 }
  0x57   :  { %2577 = vmatprep.subr.bf16.mxu0 %v3040_v0 }
  0x5a   :  { %2578 = vmatpush3.bf16.msra.mxu0 %v2834_v30 }
  0x5b   :  { %2579 = vmatprep.subr.bf16.mxu0 %v3040_v0 }
  0x5e   :  { %2580 = vmatpush3.bf16.msra.mxu0 %v2835_v31 }
  0x5f   :  { %2581 = vmatprep.subr.bf16.mxu0 %v3040_v0 }
  0x62   :  { %2582 = vmatpush3.bf16.msra.mxu0 %v2836_v32 }
  0x63   :  { %2583 = vmatprep.subr.bf16.mxu0 %v3040_v0 }
  0x66   :  { %2584 = vmatpush3.bf16.msra.mxu0 %v2837_v33 }
  0x67   :  { %2585 = vmatprep.subr.bf16.mxu0 %v3040_v0 }
  0x6a   :  { %2586 = vmatpush3.bf16.msra.mxu0 %v2838_v34  ;;  %v2849_v34 = vld [vmem:[#allocation3 + $0x1c0] sm:$0xff]  }
  0x6b   :  { %2587 = vmatprep.subr.bf16.mxu0 %v3040_v0 }
  0x6e   :  { %2588 = vmatpush3.bf16.msra.mxu0 %v2839_v35 }
  0x6f   :  { %2589 = vmatprep.subr.bf16.mxu0 %v3040_v0 }
  0x72   :  { %2590 = vmatpush3.bf16.msra.mxu0 %v2840_v63 }
  0x73   :  { %2615 = vmatprep.subr.bf16.mxu0 %v3040_v0 }
 0x108   :  { %v138_v37 = vpop.f32.mrb[0].mxu0 }
 0x109   :  { %v139_v38 = vadd.f32 %v2138_v36, %v138_v37  ;;  %v2513_v39 = vpop.f32.mrb[1].mxu0  ;;  %v2850_v36 = vld [vmem:[#allocation3 + $0x1c8] sm:$0xff]   ;;  %v2851_v37 = vld [vmem:[#allocation3 + $0x1d0] sm:$0xff]  }
 0x10a   :  { %v141_v40 = vpop.f32.mrb[2].mxu0  ;;  %v2853_v39 = vld [vmem:[#allocation3 + $0x1e0] sm:$0xff]  }
 0x10b   :  { %v2147_v41 = vmul.f32 -1.442695, %v139_v38  ;;  %v2514_v42 = vpop.f32.mrb[3].mxu0  ;;  %v2854_v40 = vld [vmem:[#allocation3 + $0x1e8] sm:$0xff]  }
 0x10c   :  { %v2856_v42 = vld [vmem:[#allocation3 + $0x1f8] sm:$0xff]  }
 0x10d   :  { %2953 = vpow2.f32 %v2147_v41  ;;  %v2855_v41 = vld [vmem:[#allocation3 + $0x1f0] sm:$0xff]  }
 0x117   :  { %v2954_v43 = vpop.eup %2953 }
 0x118   :  { %v147_v44 = vadd.f32 1.0, %v2954_v43  ;;  %v2857_v43 = vld [vmem:[#allocation3 + $0x180] sm:$0xff]  }
 0x11a   :  { %2955 = vrcp.f32 %v147_v44  ;;  %v2858_v44 = vld [vmem:[#allocation3 + $0x188] sm:$0xff]  }
 0x124   :  { %v2956_v45 = vpop.eup %2955 }
 0x125   :  { %v150_v46 = vmul.f32 %v2956_v45, %v139_v38  ;;  %v2852_v38 = vld [vmem:[#allocation3 + $0x1d8] sm:$0xff]   ;;  %v2859_v45 = vld [vmem:[#allocation3 + $0x190] sm:$0xff]  }
 0x127   :  { %v151_v48 = vpack.c.bf16 %v150_v46, %v150_v46  ;;  %v2860_v46 = vld [vmem:[#allocation3 + $0x198] sm:$0xff]  }
 0x128   :  { %v368_v49 = vpop.f32.mrb[4].mxu0 }
 0x129   :  { %2532 = vmatmul.mubr.bf16.vlgmr.msra.gmra.mrb[0].mxu1 %v151_v48  ;;  %v2553_v50 = vpop.f32.mrb[5].mxu0  ;;  %v369_v60 = vadd.f32 %v2157_v59, %v368_v49  ;;  %v2862_v48 = vld [vmem:[#allocation3 + $0x1a8] sm:$0xff]   ;;  %v2863_v49 = vld [vmem:[#allocation3 + $0x1b0] sm:$0xff]  }
 0x12a   :  { %2556 = vmatpush3.bf16.msra.mxu1 %v2825_v47  ;;  %2571 = vmatprep.mubr.msk.bf16.mxu1 %vm3041_vm0, %v3040_v0  ;;  %v371_v52 = vpop.f32.mrb[6].mxu0  ;;  %v2861_v47 = vld [vmem:[#allocation3 + $0x1a0] sm:$0xff]   ;;  %v2864_v50 = vld [vmem:[#allocation3 + $0x1b8] sm:$0xff]  }
 0x12b   :  { %2557 = vmatprep.subr.bf16.mxu1 %v3040_v0  ;;  %v2554_v53 = vpop.f32.mrb[7].mxu0  ;;  %v374_v62 = vpack.c.bf16 %v369_v60, %v369_v60 }
 0x12e   :  { %2558 = vmatpush3.bf16.msra.mxu1 %v2826_v51  ;;  %v2185_v51 = vld [vmem:[%s3312_s3 + $0x5] ss:$0 sm:$0xff] }
 0x12f   :  { %2559 = vmatprep.subr.bf16.mxu1 %v3040_v0 }
 0x132   :  { %2560 = vmatpush3.bf16.msra.mxu1 %v2827_v54 }
 0x133   :  { %2561 = vmatprep.subr.bf16.mxu1 %v3040_v0 }
 0x136   :  { %2562 = vmatpush3.bf16.msra.mxu1 %v2828_v55 }
 0x137   :  { %2563 = vmatprep.subr.bf16.mxu1 %v3040_v0 }
 0x13a   :  { %2564 = vmatpush3.bf16.msra.mxu1 %v2829_v56 }
 0x13b   :  { %2565 = vmatprep.subr.bf16.mxu1 %v3040_v0 }
 0x13e   :  { %2566 = vmatpush3.bf16.msra.mxu1 %v2830_v57 }
 0x13f   :  { %2567 = vmatprep.subr.bf16.mxu1 %v3040_v0 }
 0x142   :  { %2568 = vmatpush3.bf16.msra.mxu1 %v2831_v58 }
 0x143   :  { %2569 = vmatprep.subr.bf16.mxu1 %v3040_v0 }
 0x146   :  { %2570 = vmatpush3.bf16.msra.mxu1 %v2832_v61 }
 0x147   :  { %2595 = vmatprep.subr.bf16.mxu1 %v3040_v0 }
 0x149   :  { %2572 = vmatmul.mubr.bf16.vlgmr.msra.gmra.mrb[4].mxu1 %v374_v62 }
 0x14a   :  { %2611 = vmatprep.mubr.msk.bf16.mxu1 %vm3041_vm0, %v3040_v0  ;;  %2596 = vmatpush3.bf16.msra.mxu1 %v2841_v1 }
 0x14b   :  { %2597 = vmatprep.subr.bf16.mxu1 %v3040_v0 }
 0x14e   :  { %2598 = vmatpush3.bf16.msra.mxu1 %v2842_v2 }
 0x14f   :  { %2599 = vmatprep.subr.bf16.mxu1 %v3040_v0 }
 0x152   :  { %2600 = vmatpush3.bf16.msra.mxu1 %v2843_v3 }
 0x153   :  { %2601 = vmatprep.subr.bf16.mxu1 %v3040_v0 }
 0x156   :  { %2602 = vmatpush3.bf16.msra.mxu1 %v2844_v4  ;;  %v2865_v4 = vld [vmem:[#allocation3 + $0x200] sm:$0xff]  }
 0x157   :  { %2603 = vmatprep.subr.bf16.mxu1 %v3040_v0 }
 0x15a   :  { %2604 = vmatpush3.bf16.msra.mxu1 %v2845_v5  ;;  %v2866_v5 = vld [vmem:[#allocation3 + $0x208] sm:$0xff]  }
 0x15b   :  { %2605 = vmatprep.subr.bf16.mxu1 %v3040_v0 }
 0x15e   :  { %2606 = vmatpush3.bf16.msra.mxu1 %v2846_v6  ;;  %v2867_v6 = vld [vmem:[#allocation3 + $0x210] sm:$0xff]  }
 0x15f   :  { %2607 = vmatprep.subr.bf16.mxu1 %v3040_v0 }
 0x162   :  { %2608 = vmatpush3.bf16.msra.mxu1 %v2847_v7  ;;  %v2868_v7 = vld [vmem:[#allocation3 + $0x218] sm:$0xff]  }
 0x163   :  { %2609 = vmatprep.subr.bf16.mxu1 %v3040_v0 }
 0x166   :  { %2610 = vmatpush3.bf16.msra.mxu1 %v2848_v19 }
 0x167   :  { %2635 = vmatprep.subr.bf16.mxu1 %v3040_v0 }
 0x1fc   :  { %v256_v9 = vpop.f32.mrb[0].mxu1 }
 0x1fd   :  { %v257_v10 = vadd.f32 %v2148_v8, %v256_v9  ;;  %v2533_v11 = vpop.f32.mrb[1].mxu1  ;;  %v2869_v8 = vld [vmem:[#allocation3 + $0x220] sm:$0xff]   ;;  %v2870_v9 = vld [vmem:[#allocation3 + $0x228] sm:$0xff]  }
 0x1fe   :  { %v259_v12 = vpop.f32.mrb[2].mxu1  ;;  %v2872_v11 = vld [vmem:[#allocation3 + $0x238] sm:$0xff]  }
 0x1ff   :  { %v3156_v13 = vpack.c.bf16 %v257_v10, %v257_v10  ;;  %v2534_v14 = vpop.f32.mrb[3].mxu1  ;;  %v2871_v10 = vld [vmem:[#allocation3 + $0x230] sm:$0xff]   ;;  %v2195_v12 = vld [vmem:[%s3312_s3 + $0x6] ss:$0 sm:$0xff] }
 0x201   :  { %2592 = vmatmul.mubr.bf16.vlgmr.msra.gmra.mrb[8].mxu0 %v3156_v13 }
 0x202   :  { %2631 = vmatprep.mubr.msk.bf16.mxu0 %vm3041_vm0, %v3040_v0  ;;  %2616 = vmatpush3.bf16.msra.mxu0 %v2857_v43  ;;  %v2896_v43 = vld [vmem:[#allocation3 + $0x298] sm:$0xff]  }
 0x203   :  { %2617 = vmatprep.subr.bf16.mxu0 %v3040_v0 }
 0x206   :  { %2618 = vmatpush3.bf16.msra.mxu0 %v2858_v44  ;;  %v2897_v44 = vld [vmem:[#allocation3 + $0x2e0] sm:$0xff]  }
 0x207   :  { %2619 = vmatprep.subr.bf16.mxu0 %v3040_v0 }
 0x20a   :  { %2620 = vmatpush3.bf16.msra.mxu0 %v2859_v45  ;;  %v2898_v45 = vld [vmem:[#allocation3 + $0x2a0] sm:$0xff]  }
 0x20b   :  { %2621 = vmatprep.subr.bf16.mxu0 %v3040_v0 }
 0x20e   :  { %2622 = vmatpush3.bf16.msra.mxu0 %v2860_v46  ;;  %v2899_v46 = vld [vmem:[#allocation3 + $0x2e8] sm:$0xff]  }
 0x20f   :  { %2623 = vmatprep.subr.bf16.mxu0 %v3040_v0 }
 0x212   :  { %2624 = vmatpush3.bf16.msra.mxu0 %v2861_v47  ;;  %v2900_v47 = vld [vmem:[#allocation3 + $0x2a8] sm:$0xff]  }
 0x213   :  { %2625 = vmatprep.subr.bf16.mxu0 %v3040_v0 }
 0x216   :  { %2626 = vmatpush3.bf16.msra.mxu0 %v2862_v48  ;;  %v2901_v48 = vld [vmem:[#allocation3 + $0x2f0] sm:$0xff]  }
 0x217   :  { %2627 = vmatprep.subr.bf16.mxu0 %v3040_v0 }
 0x21a   :  { %2628 = vmatpush3.bf16.msra.mxu0 %v2863_v49  ;;  %v2902_v49 = vld [vmem:[#allocation3 + $0x2b0] sm:$0xff]  }
 0x21b   :  { %2629 = vmatprep.subr.bf16.mxu0 %v3040_v0 }
 0x21c   :  { %v479_v15 = vpop.f32.mrb[4].mxu1 }
 0x21d   :  { %v2573_v16 = vpop.f32.mrb[5].mxu1  ;;  %v480_v21 = vadd.f32 %v2166_v20, %v479_v15 }
 0x21e   :  { %v482_v17 = vpop.f32.mrb[6].mxu1  ;;  %2630 = vmatpush3.bf16.msra.mxu0 %v2864_v50  ;;  %v2214_v50 = vld [vmem:[%s3312_s3 + $0x8] ss:$0 sm:$0xff] }
 0x21f   :  { %v2574_v18 = vpop.f32.mrb[7].mxu1  ;;  %v2175_v22 = vmul.f32 -1.442695, %v480_v21  ;;  %2655 = vmatprep.subr.bf16.mxu0 %v3040_v0 }
 0x221   :  { %2957 = vpow2.f32 %v2175_v22  ;;  %v2205_v22 = vld [vmem:[%s3312_s3 + $0x7] ss:$0 sm:$0xff] }
 0x22b   :  { %v2958_v23 = vpop.eup %2957 }
 0x22c   :  { %v488_v24 = vadd.f32 1.0, %v2958_v23 }
 0x22e   :  { %2959 = vrcp.f32 %v488_v24 }
 0x238   :  { %v2960_v25 = vpop.eup %2959 }
 0x239   :  { %v491_v28 = vmul.f32 %v2960_v25, %v480_v21 }
 0x2d4   :  { %v597_v27 = vpop.f32.mrb[8].mxu0 }
 0x2d5   :  { %v598_v29 = vadd.f32 %v2176_v26, %v597_v27  ;;  %v2593_v30 = vpop.f32.mrb[9].mxu0 }
 0x2d6   :  { %v600_v31 = vpop.f32.mrb[10].mxu0  ;;  %v2875_v30 = vld [vmem:[#allocation3 + $0x250] sm:$0xff]  }
 0x2d7   :  { %v603_v32 = vadd.f32 %v598_v29, %v491_v28  ;;  %v2594_v33 = vpop.f32.mrb[11].mxu0  ;;  %v2873_v28 = vld [vmem:[#allocation3 + $0x240] sm:$0xff]   ;;  %v2874_v29 = vld [vmem:[#allocation3 + $0x248] sm:$0xff]   ;;  %v2876_v31 = vld [vmem:[#allocation3 + $0x258] sm:$0xff]  }
 0x2d8   :  { %v2878_v33 = vld [vmem:[#allocation3 + $0x268] sm:$0xff]  }
 0x2d9   :  { %v604_v35 = vpack.c.bf16 %v603_v32, %v603_v32  ;;  %v2877_v32 = vld [vmem:[#allocation3 + $0x260] sm:$0xff]  }
 0x2db   :  { %2612 = vmatmul.mubr.bf16.vlgmr.msra.gmra.mrb[8].mxu1 %v604_v35  ;;  %v2880_v35 = vld [vmem:[#allocation3 + $0x278] sm:$0xff]  }
 0x2dc   :  { %2636 = vmatpush3.bf16.msra.mxu1 %v2849_v34  ;;  %2651 = vmatprep.mubr.msk.bf16.mxu1 %vm3041_vm0, %v3040_v0  ;;  %v2879_v34 = vld [vmem:[#allocation3 + $0x270] sm:$0xff]  }
 0x2dd   :  { %2637 = vmatprep.subr.bf16.mxu1 %v3040_v0 }
 0x2e0   :  { %2638 = vmatpush3.bf16.msra.mxu1 %v2850_v36  ;;  %v2889_v36 = vld [vmem:[#allocation3 + $0x2c0] sm:$0xff]  }
 0x2e1   :  { %2639 = vmatprep.subr.bf16.mxu1 %v3040_v0 }
 0x2e4   :  { %2640 = vmatpush3.bf16.msra.mxu1 %v2851_v37  ;;  %v2890_v37 = vld [vmem:[#allocation3 + $0x280] sm:$0xff]  }
 0x2e5   :  { %2641 = vmatprep.subr.bf16.mxu1 %v3040_v0 }
 0x2e8   :  { %2642 = vmatpush3.bf16.msra.mxu1 %v2852_v38  ;;  %v2891_v38 = vld [vmem:[#allocation3 + $0x2c8] sm:$0xff]  }
 0x2e9   :  { %2643 = vmatprep.subr.bf16.mxu1 %v3040_v0 }
 0x2ec   :  { %2644 = vmatpush3.bf16.msra.mxu1 %v2853_v39  ;;  %v2892_v39 = vld [vmem:[#allocation3 + $0x288] sm:$0xff]  }
 0x2ed   :  { %2645 = vmatprep.subr.bf16.mxu1 %v3040_v0 }
 0x2f0   :  { %2646 = vmatpush3.bf16.msra.mxu1 %v2854_v40  ;;  %v2893_v40 = vld [vmem:[#allocation3 + $0x2d0] sm:$0xff]  }
 0x2f1   :  { %2647 = vmatprep.subr.bf16.mxu1 %v3040_v0 }
 0x2f4   :  { %2648 = vmatpush3.bf16.msra.mxu1 %v2855_v41  ;;  %v2894_v41 = vld [vmem:[#allocation3 + $0x290] sm:$0xff]  }
 0x2f5   :  { %2649 = vmatprep.subr.bf16.mxu1 %v3040_v0 }
 0x2f8   :  { %2650 = vmatpush3.bf16.msra.mxu1 %v2856_v42  ;;  %v2895_v42 = vld [vmem:[#allocation3 + $0x2d8] sm:$0xff]  }
 0x2f9   :  { %2675 = vmatprep.subr.bf16.mxu1 %v3040_v0 }
 0x2fb   :  { %2652 = vmatmul.mubr.bf16.vlgmr.msra.gmra.mrb[12].mxu1 %v3156_v13 }
 0x2fc   :  { %2691 = vmatprep.mubr.msk.bf16.mxu1 %vm3041_vm0, %v3040_v0  ;;  %2676 = vmatpush3.bf16.msra.mxu1 %v2873_v28  ;;  %v2911_v28 = vld [vmem:[#allocation3 + $0x370] sm:$0xff]  }
 0x2fd   :  { %2677 = vmatprep.subr.bf16.mxu1 %v3040_v0 }
 0x300   :  { %2678 = vmatpush3.bf16.msra.mxu1 %v2874_v29  ;;  %v2912_v29 = vld [vmem:[#allocation3 + $0x378] sm:$0xff]  }
 0x301   :  { %2679 = vmatprep.subr.bf16.mxu1 %v3040_v0 }
 0x304   :  { %2680 = vmatpush3.bf16.msra.mxu1 %v2875_v30 }
 0x305   :  { %2681 = vmatprep.subr.bf16.mxu1 %v3040_v0 }
 0x308   :  { %2682 = vmatpush3.bf16.msra.mxu1 %v2876_v31  ;;  %v2249_v31 = vld [vmem:[%s3312_s3 + $0xa] ss:$0 sm:$0xff] }
 0x309   :  { %2683 = vmatprep.subr.bf16.mxu1 %v3040_v0 }
 0x30c   :  { %2684 = vmatpush3.bf16.msra.mxu1 %v2877_v32 }
 0x30d   :  { %2685 = vmatprep.subr.bf16.mxu1 %v3040_v0 }
 0x310   :  { %2686 = vmatpush3.bf16.msra.mxu1 %v2878_v33 }
 0x311   :  { %2687 = vmatprep.subr.bf16.mxu1 %v3040_v0 }
 0x314   :  { %2688 = vmatpush3.bf16.msra.mxu1 %v2879_v34 }
 0x315   :  { %2689 = vmatprep.subr.bf16.mxu1 %v3040_v0 }
 0x318   :  { %2690 = vmatpush3.bf16.msra.mxu1 %v2880_v35 }
 0x319   :  { %2695 = vmatprep.subr.bf16.mxu1 %v3040_v0 }
 0x3ae   :  { %v709_v52 = vpop.f32.mrb[8].mxu1 }
 0x3af   :  { %v710_v53 = vadd.f32 %v2185_v51, %v709_v52  ;;  %v2613_v54 = vpop.f32.mrb[9].mxu1 }
 0x3b0   :  { %v712_v55 = vpop.f32.mrb[10].mxu1 }
 0x3b1   :  { %v2194_v56 = vmul.f32 -1.442695, %v710_v53  ;;  %v2614_v57 = vpop.f32.mrb[11].mxu1 }
 0x3b3   :  { %2961 = vpow2.f32 %v2194_v56 }
 0x3bd   :  { %v2962_v58 = vpop.eup %2961 }
 0x3be   :  { %v718_v59 = vadd.f32 1.0, %v2962_v58 }
 0x3c0   :  { %2963 = vrcp.f32 %v718_v59 }
 0x3ca   :  { %v2964_v60 = vpop.eup %2963 }
 0x3cb   :  { %v721_v61 = vmul.f32 %v2964_v60, %v710_v53 }
 0x3cd   :  { %v3192_v62 = vpack.c.bf16 %v721_v61, %v721_v61  ;;  %v2881_v61 = vld [vmem:[#allocation3 + $0x300] sm:$0xff]  }
 0x3ce   :  { %v945_v63 = vpop.f32.mrb[12].mxu1 }
 0x3cf   :  { %v2653_v1 = vpop.f32.mrb[13].mxu1  ;;  %2632 = vmatmul.mubr.bf16.vlgmr.msra.gmra.mrb[12].mxu0 %v3192_v62  ;;  %v946_v24 = vadd.f32 %v2205_v22, %v945_v63  ;;  %v2905_v22 = vld [vmem:[#allocation3 + $0x340] sm:$0xff]  }
 0x3d0   :  { %v948_v2 = vpop.f32.mrb[14].mxu1  ;;  %2671 = vmatprep.mubr.msk.bf16.mxu0 %vm3041_vm0, %v3040_v0  ;;  %2656 = vmatpush3.bf16.msra.mxu0 %v2865_v4  ;;  %v2882_v1 = vld [vmem:[#allocation3 + $0x308] sm:$0xff]   ;;  %v2885_v4 = vld [vmem:[#allocation3 + $0x320] sm:$0xff]  }
 0x3d1   :  { %v2654_v3 = vpop.f32.mrb[15].mxu1  ;;  %2657 = vmatprep.subr.bf16.mxu0 %v3040_v0  ;;  %v2883_v2 = vld [vmem:[#allocation3 + $0x310] sm:$0xff]  }
 0x3d2   :  { %v2884_v3 = vld [vmem:[#allocation3 + $0x318] sm:$0xff]  }
 0x3d4   :  { %2658 = vmatpush3.bf16.msra.mxu0 %v2866_v5  ;;  %v2886_v5 = vld [vmem:[#allocation3 + $0x328] sm:$0xff]  }
 0x3d5   :  { %2659 = vmatprep.subr.bf16.mxu0 %v3040_v0 }
 0x3d8   :  { %2660 = vmatpush3.bf16.msra.mxu0 %v2867_v6  ;;  %v2887_v6 = vld [vmem:[#allocation3 + $0x330] sm:$0xff]  }
 0x3d9   :  { %2661 = vmatprep.subr.bf16.mxu0 %v3040_v0 }
 0x3dc   :  { %2662 = vmatpush3.bf16.msra.mxu0 %v2868_v7  ;;  %v2888_v7 = vld [vmem:[#allocation3 + $0x338] sm:$0xff]  }
 0x3dd   :  { %2663 = vmatprep.subr.bf16.mxu0 %v3040_v0 }
 0x3e0   :  { %2664 = vmatpush3.bf16.msra.mxu0 %v2869_v8  ;;  %v2903_v8 = vld [vmem:[#allocation3 + $0x2f8] sm:$0xff]  }
 0x3e1   :  { %2665 = vmatprep.subr.bf16.mxu0 %v3040_v0 }
 0x3e4   :  { %2666 = vmatpush3.bf16.msra.mxu0 %v2870_v9  ;;  %v2904_v9 = vld [vmem:[#allocation3 + $0x2b8] sm:$0xff]  }
 0x3e5   :  { %2667 = vmatprep.subr.bf16.mxu0 %v3040_v0 }
 0x3e8   :  { %2668 = vmatpush3.bf16.msra.mxu0 %v2871_v10  ;;  %v2224_v10 = vld [vmem:[%s3312_s3 + $0x9] ss:$0 sm:$0xff] }
 0x3e9   :  { %2669 = vmatprep.subr.bf16.mxu0 %v3040_v0 }
 0x3ec   :  { %2670 = vmatpush3.bf16.msra.mxu0 %v2872_v11 }
 0x3ed   :  { %2406 = vmatprep.subr.bf16.mxu0 %v2889_v36 }
 0x4a2   :  { %v828_v14 = vpop.f32.mrb[12].mxu0 }
 0x4a3   :  { %v829_v15 = vadd.f32 %v2195_v12, %v828_v14  ;;  %v2633_v16 = vpop.f32.mrb[13].mxu0 }
 0x4a4   :  { %v831_v17 = vpop.f32.mrb[14].mxu0 }
 0x4a5   :  { %v2204_v18 = vmul.f32 -1.442695, %v829_v15  ;;  %v2634_v19 = vpop.f32.mrb[15].mxu0 }
 0x4a7   :  { %2965 = vpow2.f32 %v2204_v18 }
 0x4b1   :  { %v2966_v20 = vpop.eup %2965 }
 0x4b2   :  { %v837_v21 = vadd.f32 1.0, %v2966_v20 }
 0x4b4   :  { %2967 = vrcp.f32 %v837_v21 }
 0x4be   :  { %v2968_v23 = vpop.eup %2967 }
 0x4bf   :  { %v840_v25 = vmul.f32 %v2968_v23, %v829_v15  ;;  %v2906_v23 = vld [vmem:[#allocation3 + $0x348] sm:$0xff]  }
 0x4c1   :  { %v951_v26 = vadd.f32 %v946_v24, %v840_v25  ;;  %v2907_v24 = vld [vmem:[#allocation3 + $0x350] sm:$0xff]   ;;  %v2908_v25 = vld [vmem:[#allocation3 + $0x358] sm:$0xff]  }
 0x4c3   :  { %v952_v27 = vpack.c.bf16 %v951_v26, %v951_v26  ;;  %v2909_v26 = vld [vmem:[#allocation3 + $0x360] sm:$0xff]  }
 0x4c5   :  { %2672 = vmatmul.mubr.bf16.vlgmr.msra.gmra.mrb[16].mxu0 %v952_v27  ;;  %v2910_v27 = vld [vmem:[#allocation3 + $0x368] sm:$0xff]  }
 0x4c6   :  { %2407 = vmatpush3.bf16.msra.mxu0 %v2890_v37 }
 0x4c7   :  { %2408 = vmatprep.subr.bf16.mxu0 %v2891_v38 }
 0x4ca   :  { %2409 = vmatpush3.bf16.msra.mxu0 %v2892_v39 }
 0x4cb   :  { %2410 = vmatprep.subr.bf16.mxu0 %v2893_v40  ;;  %v2251_v40 = vld [vmem:[%s3312_s3 + $0xb] ss:$0 sm:$0xff] }
 0x4ce   :  { %2411 = vmatpush3.bf16.msra.mxu0 %v2894_v41 }
 0x4cf   :  { %2412 = vmatprep.subr.bf16.mxu0 %v2895_v42 }
 0x4d2   :  { %2413 = vmatpush3.bf16.msra.mxu0 %v2896_v43 }
 0x4d3   :  { %2414 = vmatprep.subr.bf16.mxu0 %v2897_v44 }
 0x4d6   :  { %2415 = vmatpush3.bf16.msra.mxu0 %v2898_v45  ;;  %v2913_v45 = vld [vmem:[#allocation3 + $0x400] sm:$0xff]  }
 0x4d7   :  { %2416 = vmatprep.subr.bf16.mxu0 %v2899_v46 }
 0x4da   :  { %2417 = vmatpush3.bf16.msra.mxu0 %v2900_v47  ;;  %v2914_v47 = vld [vmem:[#allocation3 + $0x408] sm:$0xff]  }
 0x4db   :  { %2418 = vmatprep.subr.bf16.mxu0 %v2901_v48  ;;  %v2915_v48 = vld [vmem:[#allocation3 + $0x410] sm:$0xff]  }
 0x4de   :  { %2419 = vmatpush3.bf16.msra.mxu0 %v2902_v49  ;;  %v2916_v49 = vld [vmem:[#allocation3 + $0x418] sm:$0xff]  }
 0x4df   :  { %2420 = vmatprep.subr.bf16.mxu0 %v2903_v8 }
 0x4e2   :  { %2421 = vmatpush3.bf16.msra.mxu0 %v2904_v9 }
 0x4e3   :  { %2715 = vmatprep.subr.bf16.mxu0 %v3040_v0 }
 0x598   :  { %v1057_v51 = vpop.f32.mrb[16].mxu0 }
 0x599   :  { %v1058_v52 = vadd.f32 %v2214_v50, %v1057_v51  ;;  %v2673_v53 = vpop.f32.mrb[17].mxu0  ;;  %v2917_v50 = vld [vmem:[#allocation3 + $0x420] sm:$0xff]   ;;  %v2918_v51 = vld [vmem:[#allocation3 + $0x428] sm:$0xff]  }
 0x59a   :  { %v1060_v54 = vpop.f32.mrb[18].mxu0  ;;  %v2920_v53 = vld [vmem:[#allocation3 + $0x438] sm:$0xff]  }
 0x59b   :  { %v2223_v55 = vmul.f32 -1.442695, %v1058_v52  ;;  %v2674_v56 = vpop.f32.mrb[19].mxu0  ;;  %v2921_v54 = vld [vmem:[#allocation3 + $0x3c0] sm:$0xff]  }
 0x59c   :  { %v2923_v56 = vld [vmem:[#allocation3 + $0x3c8] sm:$0xff]  }
 0x59d   :  { %2969 = vpow2.f32 %v2223_v55  ;;  %v2922_v55 = vld [vmem:[#allocation3 + $0x380] sm:$0xff]  }
 0x5a7   :  { %v2970_v57 = vpop.eup %2969 }
 0x5a8   :  { %v1066_v58 = vadd.f32 1.0, %v2970_v57  ;;  %v2924_v57 = vld [vmem:[#allocation3 + $0x388] sm:$0xff]  }
 0x5aa   :  { %2971 = vrcp.f32 %v1066_v58  ;;  %v2925_v58 = vld [vmem:[#allocation3 + $0x3d0] sm:$0xff]  }
 0x5b4   :  { %v2972_v59 = vpop.eup %2971 }
 0x5b5   :  { %v1069_v60 = vmul.f32 %v2972_v59, %v1058_v52  ;;  %v2919_v52 = vld [vmem:[#allocation3 + $0x430] sm:$0xff]  }
 0x5b6   :  { %v2926_v59 = vld [vmem:[#allocation3 + $0x390] sm:$0xff]  }
 0x5b7   :  { %v1072_v63 = vpack.c.bf16 %v1069_v60, %v1069_v60  ;;  %v2927_v60 = vld [vmem:[#allocation3 + $0x3d8] sm:$0xff]  }
 0x5b9   :  { %2692 = vmatmul.mubr.bf16.vlgmr.msra.gmra.mrb[16].mxu1 %v1072_v63 }
 0x5ba   :  { %2696 = vmatpush3.bf16.msra.mxu1 %v2881_v61  ;;  %2711 = vmatprep.mubr.msk.bf16.mxu1 %vm3041_vm0, %v3040_v0  ;;  %v2928_v61 = vld [vmem:[#allocation3 + $0x398] sm:$0xff]  }
 0x5bb   :  { %2697 = vmatprep.subr.bf16.mxu1 %v3040_v0 }
 0x5be   :  { %2698 = vmatpush3.bf16.msra.mxu1 %v2882_v1  ;;  %v2931_v1 = vld [vmem:[#allocation3 + $0x3e8] sm:$0xff]  }
 0x5bf   :  { %2699 = vmatprep.subr.bf16.mxu1 %v3040_v0 }
 0x5c2   :  { %2700 = vmatpush3.bf16.msra.mxu1 %v2883_v2  ;;  %v2932_v2 = vld [vmem:[#allocation3 + $0x3a8] sm:$0xff]  }
 0x5c3   :  { %2701 = vmatprep.subr.bf16.mxu1 %v3040_v0 }
 0x5c6   :  { %2702 = vmatpush3.bf16.msra.mxu1 %v2884_v3  ;;  %v2933_v3 = vld [vmem:[#allocation3 + $0x3f0] sm:$0xff]  }
 0x5c7   :  { %2703 = vmatprep.subr.bf16.mxu1 %v3040_v0 }
 0x5ca   :  { %2704 = vmatpush3.bf16.msra.mxu1 %v2885_v4  ;;  %v2934_v4 = vld [vmem:[#allocation3 + $0x3b0] sm:$0xff]  }
 0x5cb   :  { %2705 = vmatprep.subr.bf16.mxu1 %v3040_v0 }
 0x5ce   :  { %2706 = vmatpush3.bf16.msra.mxu1 %v2886_v5  ;;  %v2935_v5 = vld [vmem:[#allocation3 + $0x3f8] sm:$0xff]  }
 0x5cf   :  { %2707 = vmatprep.subr.bf16.mxu1 %v3040_v0 }
 0x5d2   :  { %2708 = vmatpush3.bf16.msra.mxu1 %v2887_v6  ;;  %v2936_v6 = vld [vmem:[#allocation3 + $0x3b8] sm:$0xff]  }
 0x5d3   :  { %2709 = vmatprep.subr.bf16.mxu1 %v3040_v0 }
 0x5d6   :  { %2710 = vmatpush3.bf16.msra.mxu1 %v2888_v7  ;;  %v2260_v7 = vld [vmem:[%s3312_s3 + $0xc] ss:$0 sm:$0xff] }
 0x5d7   :  { %2446 = vmatprep.subr.bf16.mxu1 %v2921_v54  ;;  %v2952_v54 = vld [vmem:[#allocation3 + $0x4b8] sm:$0xff]  }
 0x5d9   :  { %2712 = vmatmul.mubr.bf16.vlgmr.msra.gmra.mrb[20].mxu1 %v3156_v13 }
 0x5da   :  { %2447 = vmatpush3.bf16.msra.mxu1 %v2922_v55  ;;  %v2297_v55 = vld [vmem:[%s3312_s3 + $0xf] ss:$0 sm:$0xff] }
 0x5db   :  { %2448 = vmatprep.subr.bf16.mxu1 %v2923_v56 }
 0x5de   :  { %2449 = vmatpush3.bf16.msra.mxu1 %v2924_v57 }
 0x5df   :  { %2450 = vmatprep.subr.bf16.mxu1 %v2925_v58 }
 0x5e2   :  { %2451 = vmatpush3.bf16.msra.mxu1 %v2926_v59 }
 0x5e3   :  { %2452 = vmatprep.subr.bf16.mxu1 %v2927_v60 }
 0x5e6   :  { %2453 = vmatpush3.bf16.msra.mxu1 %v2928_v61 }
 0x68c   :  { %v1177_v11 = vpop.f32.mrb[16].mxu1 }
 0x68d   :  { %v1178_v12 = vadd.f32 %v2224_v10, %v1177_v11  ;;  %v2693_v14 = vpop.f32.mrb[17].mxu1 }
 0x68e   :  { %v1180_v15 = vpop.f32.mrb[18].mxu1 }
 0x68f   :  { %v1185_v16 = vpack.c.bf16 %v1178_v12, %v1178_v12  ;;  %v2694_v17 = vpop.f32.mrb[19].mxu1 }
 0x691   :  { %1353 = vmatprep.mubr.bf16.mxu0 %v1185_v16 }
 0x692   :  { %1354 = vmatmul.mubr.bf16.vlgmr.msra.gmra.mrb[20].mxu0 %v1072_v63  ;;  %v2930_v63 = vld [vmem:[#allocation3 + $0x3a0] sm:$0xff]  }
 0x693   :  { %2731 = vmatprep.mubr.msk.bf16.mxu0 %vm3041_vm0, %v3040_v0  ;;  %2716 = vmatpush3.bf16.msra.mxu0 %v2905_v22 }
 0x694   :  { %2717 = vmatprep.subr.bf16.mxu0 %v3040_v0 }
 0x697   :  { %2718 = vmatpush3.bf16.msra.mxu0 %v2906_v23 }
 0x698   :  { %2719 = vmatprep.subr.bf16.mxu0 %v3040_v0 }
 0x69b   :  { %2720 = vmatpush3.bf16.msra.mxu0 %v2907_v24  ;;  %v2937_v24 = vld [vmem:[#allocation3 + $0x440] sm:$0xff]  }
 0x69c   :  { %2721 = vmatprep.subr.bf16.mxu0 %v3040_v0 }
 0x69f   :  { %2722 = vmatpush3.bf16.msra.mxu0 %v2908_v25  ;;  %v2938_v25 = vld [vmem:[#allocation3 + $0x448] sm:$0xff]  }
 0x6a0   :  { %2723 = vmatprep.subr.bf16.mxu0 %v3040_v0 }
 0x6a3   :  { %2724 = vmatpush3.bf16.msra.mxu0 %v2909_v26  ;;  %v2939_v26 = vld [vmem:[#allocation3 + $0x450] sm:$0xff]  }
 0x6a4   :  { %2725 = vmatprep.subr.bf16.mxu0 %v3040_v0 }
 0x6a7   :  { %2726 = vmatpush3.bf16.msra.mxu0 %v2910_v27  ;;  %v2940_v27 = vld [vmem:[#allocation3 + $0x458] sm:$0xff]  }
 0x6a8   :  { %2727 = vmatprep.subr.bf16.mxu0 %v3040_v0 }
 0x6ab   :  { %2728 = vmatpush3.bf16.msra.mxu0 %v2911_v28  ;;  %v2942_v28 = vld [vmem:[#allocation3 + $0x468] sm:$0xff]  }
 0x6ac   :  { %v1472_v18 = vpop.f32.mrb[20].mxu1  ;;  %2729 = vmatprep.subr.bf16.mxu0 %v3040_v0 }
 0x6ad   :  { %v2713_v19 = vpop.f32.mrb[21].mxu1  ;;  %v1473_v42 = vadd.f32 %v2251_v40, %v1472_v18 }
 0x6ae   :  { %v1475_v20 = vpop.f32.mrb[22].mxu1 }
 0x6af   :  { %v2714_v21 = vpop.f32.mrb[23].mxu1  ;;  %2730 = vmatpush3.bf16.msra.mxu0 %v2912_v29  ;;  %v2943_v29 = vld [vmem:[#allocation3 + $0x470] sm:$0xff]  }
 0x6b0   :  { %2735 = vmatprep.subr.bf16.mxu0 %v3040_v0 }
 0x765   :  { %v2422_v30 = vpop.f32.mrb[20].mxu0 }
 0x766   :  { %v2423_v32 = vpop.f32.mrb[21].mxu0 }
 0x767   :  { %v2424_v33 = vadd.f32 %v2423_v32, %v2422_v30  ;;  %v2425_v34 = vpop.f32.mrb[22].mxu0  ;;  %v2944_v30 = vld [vmem:[#allocation3 + $0x478] sm:$0xff]   ;;  %v2286_v32 = vld [vmem:[%s3312_s3 + $0xd] ss:$0 sm:$0xff] }
 0x768   :  { %v2426_v35 = vpop.f32.mrb[23].mxu0 }
 0x769   :  { %v1356_v36 = vadd.f32 %v2424_v33, %v2249_v31 }
 0x76b   :  { %v2250_v37 = vmul.f32 -1.442695, %v1356_v36 }
 0x76d   :  { %2973 = vpow2.f32 %v2250_v37 }
 0x777   :  { %v2974_v38 = vpop.eup %2973 }
 0x778   :  { %v1364_v39 = vadd.f32 1.0, %v2974_v38 }
 0x77a   :  { %2975 = vrcp.f32 %v1364_v39 }
 0x784   :  { %v2976_v41 = vpop.eup %2975 }
 0x785   :  { %v1367_v43 = vmul.f32 %v2976_v41, %v1356_v36  ;;  %v2288_v41 = vld [vmem:[%s3312_s3 + $0xe] ss:$0 sm:$0xff] }
 0x787   :  { %v1478_v44 = vadd.f32 %v1473_v42, %v1367_v43 }
 0x789   :  { %v1479_v46 = vpack.c.bf16 %v1478_v44, %v1478_v44 }
 0x78b   :  { %2732 = vmatmul.mubr.bf16.vlgmr.msra.gmra.mrb[24].mxu0 %v1479_v46 }
 0x78c   :  { %2736 = vmatpush3.bf16.msra.mxu0 %v2913_v45  ;;  %2751 = vmatprep.mubr.msk.bf16.mxu0 %vm3041_vm0, %v3040_v0 }
 0x78d   :  { %2737 = vmatprep.subr.bf16.mxu0 %v3040_v0 }
 0x790   :  { %2738 = vmatpush3.bf16.msra.mxu0 %v2914_v47  ;;  %v2945_v47 = vld [vmem:[#allocation3 + $0x480] sm:$0xff]  }
 0x791   :  { %2739 = vmatprep.subr.bf16.mxu0 %v3040_v0 }
 0x794   :  { %2740 = vmatpush3.bf16.msra.mxu0 %v2915_v48  ;;  %v2946_v48 = vld [vmem:[#allocation3 + $0x488] sm:$0xff]  }
 0x795   :  { %2741 = vmatprep.subr.bf16.mxu0 %v3040_v0 }
 0x798   :  { %2742 = vmatpush3.bf16.msra.mxu0 %v2916_v49  ;;  %v2947_v49 = vld [vmem:[#allocation3 + $0x490] sm:$0xff]  }
 0x799   :  { %2743 = vmatprep.subr.bf16.mxu0 %v3040_v0 }
 0x79c   :  { %2744 = vmatpush3.bf16.msra.mxu0 %v2917_v50  ;;  %v2948_v50 = vld [vmem:[#allocation3 + $0x498] sm:$0xff]  }
 0x79d   :  { %2745 = vmatprep.subr.bf16.mxu0 %v3040_v0 }
 0x7a0   :  { %2746 = vmatpush3.bf16.msra.mxu0 %v2918_v51  ;;  %v2949_v51 = vld [vmem:[#allocation3 + $0x4a0] sm:$0xff]  }
 0x7a1   :  { %2747 = vmatprep.subr.bf16.mxu0 %v3040_v0 }
 0x7a4   :  { %2748 = vmatpush3.bf16.msra.mxu0 %v2919_v52  ;;  %v2950_v52 = vld [vmem:[#allocation3 + $0x4a8] sm:$0xff]  }
 0x7a5   :  { %2749 = vmatprep.subr.bf16.mxu0 %v3040_v0 }
 0x7a8   :  { %2750 = vmatpush3.bf16.msra.mxu0 %v2920_v53  ;;  %v2951_v53 = vld [vmem:[#allocation3 + $0x4b0] sm:$0xff]  }
 0x7a9   :  { %2775 = vmatprep.subr.bf16.mxu0 %v3040_v0 }
 0x7ab   :  { %2752 = vmatmul.mubr.bf16.vlgmr.msra.gmra.mrb[28].mxu0 %v3156_v13  ;;  %v2929_v13 = vld [vmem:[#allocation3 + $0x3e0] sm:$0xff]  }
 0x7ac   :  { %2791 = vmatprep.mubr.msk.bf16.mxu0 %vm3041_vm0, %v3040_v0  ;;  %2454 = vmatprep.subr.bf16.mxu1 %v2929_v13 }
 0x7ad   :  { %2455 = vmatpush3.bf16.msra.mxu1 %v2930_v63  ;;  %2776 = vmatpush3.bf16.msra.mxu0 %v2945_v47 }
 0x7ae   :  { %2456 = vmatprep.subr.bf16.mxu1 %v2931_v1  ;;  %2777 = vmatprep.subr.bf16.mxu0 %v3040_v0 }
 0x7b1   :  { %2457 = vmatpush3.bf16.msra.mxu1 %v2932_v2  ;;  %2778 = vmatpush3.bf16.msra.mxu0 %v2946_v48 }
 0x7b2   :  { %2458 = vmatprep.subr.bf16.mxu1 %v2933_v3  ;;  %2779 = vmatprep.subr.bf16.mxu0 %v3040_v0 }
 0x7b5   :  { %2459 = vmatpush3.bf16.msra.mxu1 %v2934_v4  ;;  %2780 = vmatpush3.bf16.msra.mxu0 %v2947_v49 }
 0x7b6   :  { %2460 = vmatprep.subr.bf16.mxu1 %v2935_v5  ;;  %2781 = vmatprep.subr.bf16.mxu0 %v3040_v0 }
 0x7b9   :  { %2461 = vmatpush3.bf16.msra.mxu1 %v2936_v6  ;;  %2782 = vmatpush3.bf16.msra.mxu0 %v2948_v50 }
 0x7ba   :  { %2755 = vmatprep.subr.bf16.mxu1 %v3040_v0  ;;  %2783 = vmatprep.subr.bf16.mxu0 %v3040_v0 }
 0x7bd   :  { %2784 = vmatpush3.bf16.msra.mxu0 %v2949_v51 }
 0x7be   :  { %2785 = vmatprep.subr.bf16.mxu0 %v3040_v0 }
 0x7c1   :  { %2786 = vmatpush3.bf16.msra.mxu0 %v2950_v52 }
 0x7c2   :  { %2787 = vmatprep.subr.bf16.mxu0 %v3040_v0 }
 0x7c5   :  { %2788 = vmatpush3.bf16.msra.mxu0 %v2951_v53 }
 0x7c6   :  { %2789 = vmatprep.subr.bf16.mxu0 %v3040_v0 }
 0x7c9   :  { %2790 = vmatpush3.bf16.msra.mxu0 %v2952_v54 }
 0x85e   :  { %v1584_v8 = vpop.f32.mrb[24].mxu0 }
 0x85f   :  { %v1585_v9 = vadd.f32 %v2260_v7, %v1584_v8  ;;  %v2733_v10 = vpop.f32.mrb[25].mxu0 }
 0x860   :  { %v1587_v11 = vpop.f32.mrb[26].mxu0 }
 0x861   :  { %v2269_v12 = vmul.f32 -1.442695, %v1585_v9  ;;  %v2734_v14 = vpop.f32.mrb[27].mxu0 }
 0x863   :  { %2977 = vpow2.f32 %v2269_v12 }
 0x86d   :  { %v2978_v15 = vpop.eup %2977 }
 0x86e   :  { %v1593_v16 = vadd.f32 1.0, %v2978_v15 }
 0x870   :  { %2979 = vrcp.f32 %v1593_v16 }
 0x87a   :  { %v2980_v17 = vpop.eup %2979 }
 0x87b   :  { %v1596_v18 = vmul.f32 %v2980_v17, %v1585_v9 }
 0x87d   :  { %v1599_v19 = vpack.c.bf16 %v1596_v18, %v1596_v18 }
 0x87e   :  { %v1886_v20 = vpop.f32.mrb[28].mxu0 }
 0x87f   :  { %v2753_v21 = vpop.f32.mrb[29].mxu0  ;;  %1767 = vmatprep.mubr.bf16.mxu1 %v1599_v19  ;;  %v1887_v43 = vadd.f32 %v2288_v41, %v1886_v20 }
 0x880   :  { %v1889_v22 = vpop.f32.mrb[30].mxu0  ;;  %1768 = vmatmul.mubr.bf16.vlgmr.msra.gmra.mrb[24].mxu1 %v3192_v62  ;;  %v2941_v62 = vld [vmem:[#allocation3 + $0x460] sm:$0xff]  }
 0x881   :  { %v2754_v23 = vpop.f32.mrb[31].mxu0  ;;  %2771 = vmatprep.mubr.msk.bf16.mxu1 %vm3041_vm0, %v3040_v0  ;;  %2756 = vmatpush3.bf16.msra.mxu1 %v2937_v24 }
 0x882   :  { %2757 = vmatprep.subr.bf16.mxu1 %v3040_v0 }
 0x885   :  { %2758 = vmatpush3.bf16.msra.mxu1 %v2938_v25 }
 0x886   :  { %2759 = vmatprep.subr.bf16.mxu1 %v3040_v0 }
 0x889   :  { %2760 = vmatpush3.bf16.msra.mxu1 %v2939_v26 }
 0x88a   :  { %2761 = vmatprep.subr.bf16.mxu1 %v3040_v0 }
 0x88d   :  { %2762 = vmatpush3.bf16.msra.mxu1 %v2940_v27 }
 0x88e   :  { %2763 = vmatprep.subr.bf16.mxu1 %v3040_v0 }
 0x891   :  { %2764 = vmatpush3.bf16.msra.mxu1 %v2941_v62 }
 0x892   :  { %2765 = vmatprep.subr.bf16.mxu1 %v3040_v0 }
 0x895   :  { %2766 = vmatpush3.bf16.msra.mxu1 %v2942_v28 }
 0x896   :  { %2767 = vmatprep.subr.bf16.mxu1 %v3040_v0 }
 0x899   :  { %2768 = vmatpush3.bf16.msra.mxu1 %v2943_v29 }
 0x89a   :  { %2769 = vmatprep.subr.bf16.mxu1 %v3040_v0  ;;  %v2307_v0 = vld [vmem:[%s3312_s3 + $0x10] ss:$0 sm:$0xff] }
 0x89d   :  { %2770 = vmatpush3.bf16.msra.mxu1 %v2944_v30 }
 0x953   :  { %v2462_v31 = vpop.f32.mrb[24].mxu1 }
 0x954   :  { %v2463_v33 = vpop.f32.mrb[25].mxu1 }
 0x955   :  { %v2464_v34 = vadd.f32 %v2463_v33, %v2462_v31  ;;  %v2465_v35 = vpop.f32.mrb[26].mxu1 }
 0x956   :  { %v2466_v36 = vpop.f32.mrb[27].mxu1 }
 0x957   :  { %v1770_v37 = vadd.f32 %v2464_v34, %v2286_v32 }
 0x959   :  { %v2287_v38 = vmul.f32 -1.442695, %v1770_v37 }
 0x95b   :  { %2981 = vpow2.f32 %v2287_v38 }
 0x965   :  { %v2982_v39 = vpop.eup %2981 }
 0x966   :  { %v1778_v40 = vadd.f32 1.0, %v2982_v39 }
 0x968   :  { %2983 = vrcp.f32 %v1778_v40 }
 0x972   :  { %v2984_v42 = vpop.eup %2983 }
 0x973   :  { %v1781_v44 = vmul.f32 %v2984_v42, %v1770_v37 }
 0x975   :  { %v1892_v45 = vadd.f32 %v1887_v43, %v1781_v44 }
 0x977   :  { %v1893_v46 = vpack.c.bf16 %v1892_v45, %v1892_v45 }
 0x979   :  { %2772 = vmatmul.mubr.bf16.vlgmr.msra.gmra.mrb[28].mxu1 %v1893_v46 }
 0xa4c   :  { %v1998_v56 = vpop.f32.mrb[28].mxu1 }
 0xa4d   :  { %v1999_v57 = vadd.f32 %v2297_v55, %v1998_v56  ;;  %v2773_v58 = vpop.f32.mrb[29].mxu1 }
 0xa4e   :  { %v2001_v59 = vpop.f32.mrb[30].mxu1 }
 0xa4f   :  { %v2306_v60 = vmul.f32 -1.442695, %v1999_v57  ;;  %v2774_v61 = vpop.f32.mrb[31].mxu1 }
 0xa51   :  { %2985 = vpow2.f32 %v2306_v60 }
 0xa5b   :  { %v2986_v13 = vpop.eup %2985 }
 0xa5c   :  { %v2007_v63 = vadd.f32 1.0, %v2986_v13 }
 0xa5e   :  { %2987 = vrcp.f32 %v2007_v63 }
 0xa68   :  { %v2988_v1 = vpop.eup %2987 }
 0xa69   :  { %v2010_v2 = vmul.f32 %v2988_v1, %v1999_v57 }
 0xa6b   :  { %v2011_v3 = vpack.c.bf16 %v2010_v2, %v2010_v2 }
 0xa6d   :  { %2792 = vmatmul.mubr.bf16.vlgmr.msra.gmra.mrb[32].mxu0 %v2011_v3 }
 0xb40   :  { %v2116_v4 = vpop.f32.mrb[32].mxu0 }
 0xb41   :  { %v2117_v5 = vadd.f32 %v2307_v0, %v2116_v4  ;;  %v2793_v6 = vpop.f32.mrb[33].mxu0 }
 0xb42   :  { %v2119_v7 = vpop.f32.mrb[34].mxu0 }
 0xb43   :  { %2122 = vst [vmem:[#allocation6] sm:$0xff] %v2117_v5  ;;  %v2794_v8 = vpop.f32.mrb[35].mxu0 }
 0xb44   :  { %3022 = shalt.err (!%p3019_p12)
}
 0xb45   :  { %s3023_s3 = scalar_lea.hbm %s3313_s4, 128 }
 0xb46   :  { %p3024_p13 = scmp.ne.s32.totalorder %s3313_s4, %s3023_s3  ;;  %p3027_p0 = scmp.lt.u32.totalorder %s3023_s3, %s3313_s4 }
 0xb48   :  { %p3029_p1 = pnand %p3027_p0, %p3024_p13 }
 0xb4a   :  { %3032 = shalt.err (!%p3029_p1)
}
 0xb4b   :  { %2132 = dma.vmem_to_hbm [thread:$0]  %s2130_s10, 128, %s3313_s4, [#allocation5]  }
 0xb4c   :  { %3035 = dma.done.wait [#allocation5], 128  }
 0xb4d   :  { %3036 = vsyncadd [#allocation5], 4294967168 }
 0xb4e   :  { %2136 = vsyncpa [#allocation4], 1 }
 0xb4f   :  { %2137 = vsyncpa [#allocation5], 1 }

</bundles_post_ra>
